<compile_context>
chip_gen: v7x
topology: tpu7x:2x2x1
jax: 0.10.0
libtpu: 0.0.40
codegen_flags: <defaults>
</compile_context>

<pallas_src>
import functools
import numpy as np
import jax
import jax.numpy as jnp
from jax import lax
from jax.experimental import pallas as pl
from jax.experimental.pallas import tpu as pltpu

NEG = -1e9  # large negative instead of -inf (avoids NaN risk if a row were fully masked)


# ----------------------------- glue helpers ---------------------------------

def window_partition(x, p):
    # x: [b, H, W, C] -> [b, nw, p*p, C]  (nw = (H//p)*(W//p))
    b, H, W, c = x.shape
    w1, w2 = H // p, W // p
    x = x.reshape(b, w1, p, w2, p, c).transpose(0, 1, 3, 2, 4, 5)   # b w1 w2 p1 p2 c
    return x.reshape(b, w1 * w2, p * p, c), w1, w2


def window_reverse(xw, p, w1, w2):
    # xw: [b, nw, p*p, C] -> [b, H, W, C]
    b, nw, p2, c = xw.shape
    x = xw.reshape(b, w1, w2, p, p, c).transpose(0, 1, 3, 2, 4, 5)
    return x.reshape(b, w1 * p, w2 * p, c)


def relative_bias(rel_params_hww, p):
    # rel_params_hww: [n_heads, 2p-1, 2p-1] -> [n_heads, p*p, p*p]
    cord = np.array([[i, j] for i in range(p) for j in range(p)])
    relation = cord[:, None, :] - cord[None, :, :] + p - 1           # [p2, p2, 2]
    return rel_params_hww[:, jnp.asarray(relation[..., 0]), jnp.asarray(relation[..., 1])]


def shift_mask_np(hw, ww, p, shift, shifted, neg):
    # Additive shift mask [nw, p*p, p*p] with 0 / neg (matches masked_fill semantics).
    m = np.zeros((hw, ww, p, p, p, p), dtype=bool)
    if shifted:
        s = p - shift
        m[-1, :, :s, :, s:, :] = True
        m[-1, :, s:, :, :s, :] = True
        m[:, -1, :, :s, :, s:] = True
        m[:, -1, :, s:, :, :s] = True
    m = m.reshape(hw * ww, p * p, p * p)
    return np.where(m, neg, 0.0).astype(np.float32)


def _pick_window_block(nw, p2, max_rows=256):
    # Largest divisor of nw whose row slab S = WB*p2 stays <= max_rows.
    wb = 1
    for cand in range(1, nw + 1):
        if nw % cand == 0 and cand * p2 <= max_rows:
            wb = cand
    return wb


def build_fused_bias(rel_hpp, w1, w2, p, wb, shifted):
    """Fused additive bias [num_wblocks, n_heads, S, S]:
    relative-position bias + SW shift mask + block-diagonal window mask."""
    nh, p2, _ = rel_hpp.shape
    nw = w1 * w2
    num_wb = nw // wb
    S = wb * p2
    smask = jnp.asarray(shift_mask_np(w1, w2, p, p // 2, shifted, NEG))   # [nw, p2, p2]
    per_win = rel_hpp[None, :, :, :] + smask[:, None, :, :]              # [nw, nh, p2, p2]
    per_win = per_win.reshape(num_wb, wb, nh, p2, p2)
    per_win = jnp.moveaxis(per_win, 2, 1)                                # [nwb, nh, wb, p2, p2]
    idx = np.arange(S)
    wi, ti = idx // p2, idx % p2
    dense = per_win[:, :, wi[:, None], ti[:, None], ti[None, :]]         # [nwb, nh, S, S]
    same = jnp.asarray(wi[:, None] == wi[None, :])                       # block-diagonal
    return jnp.where(same, dense, jnp.float32(NEG)).astype(jnp.float32)


# ----------------------------- Pallas kernel ---------------------------------

def _wmsa_kernel(x_ref, wqkv_ref, bqkv_ref, bias_ref, wout_ref, bout_ref, o_ref,
                 *, n_heads, head_dim, input_dim, out_dim, scale):
    S = x_ref.shape[1]
    C = input_dim
    hd = head_dim

    # One big QKV projection for the whole WB-window slab (bf16 in, f32 acc).
    x = x_ref[0]                                                     # [S, C] bf16
    qkv = jnp.dot(x, wqkv_ref[...], preferred_element_type=jnp.float32)
    qkv = qkv + bqkv_ref[...]                                        # [S, 3C] f32

    # Output accumulator, initialised once with the broadcast output bias.
    y = jnp.broadcast_to(bout_ref[...], (S, out_dim)).astype(jnp.float32)

    for h in range(n_heads):                                         # static unroll
        qh = (qkv[:, h * hd:(h + 1) * hd] * scale).astype(jnp.bfloat16)
        kh = qkv[:, C + h * hd:C + (h + 1) * hd].astype(jnp.bfloat16)
        vh = qkv[:, 2 * C + h * hd:2 * C + (h + 1) * hd].astype(jnp.bfloat16)

        # Dense SxS scores: contract head_dim of both operands (no explicit .T).
        sim = lax.dot_general(qh, kh, (((1,), (1,)), ((), ())),
                              preferred_element_type=jnp.float32)    # [S, S]
        # Fused relative bias + shift mask + block-diagonal window mask.
        sim = sim + bias_ref[0, h]

        # Numerically-stable softmax; normalize via EUP approximate reciprocal.
        m = jnp.max(sim, axis=-1, keepdims=True)
        e = jnp.exp(sim - m)
        denom = jnp.sum(e, axis=-1, keepdims=True)
        probs = (e * pl.reciprocal(denom, approx=True)).astype(jnp.bfloat16)

        out_h = jnp.dot(probs, vh, preferred_element_type=jnp.float32)   # [S, hd]
        # Head merge: accumulate through the matching slice of Wout
        # (== concat over heads followed by the output projection).
        y = y + jnp.dot(out_h.astype(jnp.bfloat16), wout_ref[h],
                        preferred_element_type=jnp.float32)          # [S, out_dim]

    o_ref[0] = y.astype(o_ref.dtype)


def wmsa_forward(x, params, *, window_size, head_dim, wtype):
    """x: [b, H, W, C] float32 -> [b, H, W, output_dim] float32."""
    p = window_size
    C = x.shape[-1]
    out_dim = params["wout"].shape[1]
    n_heads = C // head_dim
    scale = head_dim ** (-0.5)
    shifted = (wtype != "W")

    if shifted:
        x = jnp.roll(x, shift=(-(p // 2), -(p // 2)), axis=(1, 2))

    xw, w1, w2 = window_partition(x, p)                              # [b, nw, p2, C]
    b, nw, p2, _ = xw.shape

    WB = _pick_window_block(nw, p2)                                  # windows per step
    num_wb = nw // WB
    S = WB * p2

    # bf16 MXU inputs (f32 accumulation inside the kernel); biases/bias-table stay f32.
    x_flat = xw.reshape(b, nw * p2, C).astype(jnp.bfloat16)
    wqkv = params["wqkv"].astype(jnp.bfloat16)                       # [C, 3C]
    wout = params["wout"].reshape(n_heads, head_dim, out_dim).astype(jnp.bfloat16)
    bqkv = params["bqkv"].reshape(1, 3 * C).astype(jnp.float32)
    bout = params["bout"].reshape(1, out_dim).astype(jnp.float32)

    rel = relative_bias(params["rel"], p)                            # [nh, p2, p2]
    bias = build_fused_bias(rel, w1, w2, p, WB, shifted)             # [num_wb, nh, S, S]

    kernel = functools.partial(
        _wmsa_kernel, n_heads=n_heads, head_dim=head_dim,
        input_dim=C, out_dim=out_dim, scale=scale)

    out = pl.pallas_call(
        kernel,
        out_shape=jax.ShapeDtypeStruct((b, nw * p2, out_dim), jnp.float32),
        grid_spec=pltpu.PrefetchScalarGridSpec(
            num_scalar_prefetch=0,
            grid=(b, num_wb),
            in_specs=[
                pl.BlockSpec((1, S, C), lambda i, j: (i, j, 0)),                 # x slab
                pl.BlockSpec((C, 3 * C), lambda i, j: (0, 0)),                   # Wqkv (resident)
                pl.BlockSpec((1, 3 * C), lambda i, j: (0, 0)),                   # bqkv
                pl.BlockSpec((1, n_heads, S, S), lambda i, j: (j, 0, 0, 0)),     # fused bias
                pl.BlockSpec((n_heads, head_dim, out_dim), lambda i, j: (0, 0, 0)),  # Wout
                pl.BlockSpec((1, out_dim), lambda i, j: (0, 0)),                 # bout
            ],
            out_specs=pl.BlockSpec((1, S, out_dim), lambda i, j: (i, j, 0)),
        ),
        compiler_params=pltpu.CompilerParams(
            dimension_semantics=("parallel", "parallel")),
    )(x_flat, wqkv, bqkv, bias, wout, bout)

    y = out.reshape(b, nw, p2, out_dim)
    y = window_reverse(y, p, w1, w2)
    if shifted:
        y = jnp.roll(y, shift=(p // 2, p // 2), axis=(1, 2))
    return y


# ----------------------------- pure-JAX reference ----------------------------

def wmsa_reference(x, params, *, window_size, head_dim, wtype):
    p = window_size
    C = x.shape[-1]
    n_heads = C // head_dim
    scale = head_dim ** (-0.5)
    shifted = (wtype != "W")
    if shifted:
        x = jnp.roll(x, shift=(-(p // 2), -(p // 2)), axis=(1, 2))
    xw, w1, w2 = window_partition(x, p)
    b, nw, p2, _ = xw.shape
    qkv = xw @ params["wqkv"] + params["bqkv"]                       # [b, nw, p2, 3C]
    qkv = qkv.reshape(b, nw, p2, 3 * n_heads, head_dim)
    qkv = jnp.moveaxis(qkv, 3, 0)                                    # [3nh, b, nw, p2, hd]
    q, k, v = qkv[:n_heads], qkv[n_heads:2 * n_heads], qkv[2 * n_heads:]
    sim = jnp.einsum("hbwpc,hbwqc->hbwpq", q, k) * scale
    sim = sim + relative_bias(params["rel"], p)[:, None, None]
    mask = jnp.asarray(shift_mask_np(w1, w2, p, p // 2, shifted, -np.inf))
    sim = sim + mask[None, None]
    probs = jax.nn.softmax(sim, axis=-1)
    out = jnp.einsum("hbwij,hbwjc->hbwic", probs, v)
    out = jnp.moveaxis(out, 0, 3).reshape(b, nw, p2, C)              # 'h b w p c -> b w p (h c)'
    out = out @ params["wout"] + params["bout"]
    y = window_reverse(out, p, w1, w2)
    if shifted:
        y = jnp.roll(y, shift=(p // 2, p // 2), axis=(1, 2))
    return y


# --------------------------------- main ---------------------------------------

if __name__ == "__main__":
    # Small shapes consistent with the module.
    input_dim = 32
    output_dim = 32
    head_dim = 8
    window_size = 4
    n_heads = input_dim // head_dim
    b, H, W = 2, 8, 8

    key = jax.random.PRNGKey(0)
    kx, k1, k2, k3, k4, k5 = jax.random.split(key, 6)
    x = jax.random.normal(kx, (b, H, W, input_dim), dtype=jnp.float32)

    # Deterministic synthetic parameters (nn.Linear weights stored as [in, out]).
    params = {
        "wqkv": (jax.random.normal(k1, (input_dim, 3 * input_dim)) * 0.02).astype(jnp.float32),
        "bqkv": (jax.random.normal(k2, (3 * input_dim,)) * 0.02).astype(jnp.float32),
        # relative_position_params after __init__ reshaping: [n_heads, 2p-1, 2p-1]
        "rel": (jax.random.normal(k3, (n_heads, 2 * window_size - 1, 2 * window_size - 1))
                * 0.02).astype(jnp.float32),
        "wout": (jax.random.normal(k4, (input_dim, output_dim)) * 0.02).astype(jnp.float32),
        "bout": (jax.random.normal(k5, (output_dim,)) * 0.02).astype(jnp.float32),
    }

    for wtype in ("W", "SW"):
        out = wmsa_forward(x, params, window_size=window_size, head_dim=head_dim, wtype=wtype)
        out = jax.block_until_ready(out)
        ref = wmsa_reference(x, params, window_size=window_size, head_dim=head_dim, wtype=wtype)
        ref = jax.block_until_ready(ref)
        assert out.shape == (b, H, W, output_dim)
        # bf16 MXU inputs + approx-reciprocal softmax vs f32 reference -> mixed-precision tolerance.
        if not np.allclose(np.asarray(out), np.asarray(ref), rtol=3e-2, atol=3e-3):
            err = float(np.max(np.abs(np.asarray(out) - np.asarray(ref))))
            raise AssertionError(f"Pallas WMSA ({wtype}) mismatch vs JAX reference (max abs err {err})")

    print("KERNEL_OK")
</pallas_src>

<mosaic_0001>
module attributes {stable_mosaic.version = 11 : i64} {
  func.func @_wmsa_kernel(%arg0: i32, %arg1: i32, %arg2: memref<1x64x32xbf16, #tpu.memory_space<vmem>>, %arg3: memref<32x96xbf16, #tpu.memory_space<vmem>>, %arg4: memref<1x96xf32, #tpu.memory_space<vmem>>, %arg5: memref<1x4x64x64xf32, #tpu.memory_space<vmem>>, %arg6: memref<4x8x32xbf16, #tpu.memory_space<vmem>>, %arg7: memref<1x32xf32, #tpu.memory_space<vmem>>, %arg8: memref<1x64x32xf32, #tpu.memory_space<vmem>>) attributes {dimension_semantics = [#tpu.dimension_semantics<parallel>, #tpu.dimension_semantics<parallel>], iteration_bounds = array<i64: 2, 1>, scalar_prefetch = 0 : i64, scratch_operands = 0 : i64, tpu.core_type = #tpu.core_type<tc>, window_params = [{transform_indices = @transform_0, window_bounds = array<i64: 1, 64, 32>}, {pipeline_mode = #tpu.pipeline_mode<synchronous>, transform_indices = @transform_1, window_bounds = array<i64: 32, 96>}, {pipeline_mode = #tpu.pipeline_mode<synchronous>, transform_indices = @transform_2, window_bounds = array<i64: 1, 96>}, {transform_indices = @transform_3, window_bounds = array<i64: 1, 4, 64, 64>}, {pipeline_mode = #tpu.pipeline_mode<synchronous>, transform_indices = @transform_4, window_bounds = array<i64: 4, 8, 32>}, {pipeline_mode = #tpu.pipeline_mode<synchronous>, transform_indices = @transform_5, window_bounds = array<i64: 1, 32>}, {transform_indices = @transform_6, window_bounds = array<i64: 1, 64, 32>}]} {
    %c0 = arith.constant 0 : index
    %c0_0 = arith.constant 0 : index
    %c0_1 = arith.constant 0 : index
    %0 = vector.load %arg2[%c0, %c0_0, %c0_1] : memref<1x64x32xbf16, #tpu.memory_space<vmem>>, vector<1x64x32xbf16>
    %1 = vector.shape_cast %0 : vector<1x64x32xbf16> to vector<64x32xbf16>
    %c0_2 = arith.constant 0 : index
    %c0_3 = arith.constant 0 : index
    %2 = vector.load %arg3[%c0_2, %c0_3] : memref<32x96xbf16, #tpu.memory_space<vmem>>, vector<32x96xbf16>
    %cst = arith.constant dense<0.000000e+00> : vector<64x96xf32>
    %3 = tpu.matmul %1, %2, %cst {dimension_numbers = #tpu.dot_dimension_numbers<[1], [0], [0], [1], [0, 0, 1, 1], [], []>} : vector<64x32xbf16>, vector<32x96xbf16>, vector<64x96xf32> -> vector<64x96xf32>
    %c0_4 = arith.constant 0 : index
    %c0_5 = arith.constant 0 : index
    %4 = vector.load %arg4[%c0_4, %c0_5] : memref<1x96xf32, #tpu.memory_space<vmem>>, vector<1x96xf32>
    %5 = vector.broadcast %4 : vector<1x96xf32> to vector<64x96xf32>
    %6 = arith.addf %3, %5 : vector<64x96xf32>
    %c0_6 = arith.constant 0 : index
    %c0_7 = arith.constant 0 : index
    %7 = vector.load %arg7[%c0_6, %c0_7] : memref<1x32xf32, #tpu.memory_space<vmem>>, vector<1x32xf32>
    %8 = vector.shape_cast %7 : vector<1x32xf32> to vector<1x32xf32>
    %9 = vector.broadcast %8 : vector<1x32xf32> to vector<64x32xf32>
    %10 = vector.extract_strided_slice %6 {offsets = [0, 0], sizes = [64, 8], strides = [1, 1]} : vector<64x96xf32> to vector<64x8xf32>
    %cst_8 = arith.constant 0.353553385 : f32
    %11 = vector.broadcast %cst_8 : f32 to vector<64x8xf32>
    %12 = arith.mulf %10, %11 : vector<64x8xf32>
    %13 = arith.truncf %12 : vector<64x8xf32> to vector<64x8xbf16>
    %14 = vector.extract_strided_slice %6 {offsets = [0, 32], sizes = [64, 8], strides = [1, 1]} : vector<64x96xf32> to vector<64x8xf32>
    %15 = arith.truncf %14 : vector<64x8xf32> to vector<64x8xbf16>
    %16 = vector.extract_strided_slice %6 {offsets = [0, 64], sizes = [64, 8], strides = [1, 1]} : vector<64x96xf32> to vector<64x8xf32>
    %17 = arith.truncf %16 : vector<64x8xf32> to vector<64x8xbf16>
    %cst_9 = arith.constant dense<0.000000e+00> : vector<64x64xf32>
    %18 = tpu.matmul %13, %15, %cst_9 {dimension_numbers = #tpu.dot_dimension_numbers<[1], [1], [0], [0], [0, 0, 1, 0], [], []>} : vector<64x8xbf16>, vector<64x8xbf16>, vector<64x64xf32> -> vector<64x64xf32>
    %c0_10 = arith.constant 0 : index
    %c0_11 = arith.constant 0 : index
    %c0_12 = arith.constant 0 : index
    %c0_13 = arith.constant 0 : index
    %19 = vector.load %arg5[%c0_10, %c0_11, %c0_12, %c0_13] : memref<1x4x64x64xf32, #tpu.memory_space<vmem>>, vector<1x1x64x64xf32>
    %20 = vector.shape_cast %19 : vector<1x1x64x64xf32> to vector<64x64xf32>
    %21 = arith.addf %18, %20 : vector<64x64xf32>
    %cst_14 = arith.constant dense<0xFF800000> : vector<64xf32>
    %22 = vector.multi_reduction <maximumf>, %21, %cst_14 [1] : vector<64x64xf32> to vector<64xf32>
    %23 = vector.shape_cast %22 : vector<64xf32> to vector<64x1xf32>
    %24 = vector.broadcast %23 : vector<64x1xf32> to vector<64x64xf32>
    %25 = arith.subf %21, %24 : vector<64x64xf32>
    %26 = math.exp %25 : vector<64x64xf32>
    %cst_15 = arith.constant dense<0.000000e+00> : vector<64xf32>
    %27 = vector.multi_reduction <add>, %26, %cst_15 [1] : vector<64x64xf32> to vector<64xf32>
    %28 = vector.shape_cast %27 : vector<64xf32> to vector<64x1xf32>
    %29 = tpu.reciprocal %28 {approx = true} : vector<64x1xf32> -> vector<64x1xf32>
    %30 = vector.broadcast %29 : vector<64x1xf32> to vector<64x64xf32>
    %31 = arith.mulf %26, %30 : vector<64x64xf32>
    %32 = arith.truncf %31 : vector<64x64xf32> to vector<64x64xbf16>
    %cst_16 = arith.constant dense<0.000000e+00> : vector<64x8xf32>
    %33 = tpu.matmul %32, %17, %cst_16 {dimension_numbers = #tpu.dot_dimension_numbers<[1], [0], [0], [1], [0, 0, 1, 1], [], []>} : vector<64x64xbf16>, vector<64x8xbf16>, vector<64x8xf32> -> vector<64x8xf32>
    %34 = arith.truncf %33 : vector<64x8xf32> to vector<64x8xbf16>
    %c0_17 = arith.constant 0 : index
    %c0_18 = arith.constant 0 : index
    %c0_19 = arith.constant 0 : index
    %35 = vector.load %arg6[%c0_17, %c0_18, %c0_19] : memref<4x8x32xbf16, #tpu.memory_space<vmem>>, vector<1x8x32xbf16>
    %36 = vector.shape_cast %35 : vector<1x8x32xbf16> to vector<8x32xbf16>
    %cst_20 = arith.constant dense<0.000000e+00> : vector<64x32xf32>
    %37 = tpu.matmul %34, %36, %cst_20 {dimension_numbers = #tpu.dot_dimension_numbers<[1], [0], [0], [1], [0, 0, 1, 1], [], []>} : vector<64x8xbf16>, vector<8x32xbf16>, vector<64x32xf32> -> vector<64x32xf32>
    %38 = arith.addf %9, %37 : vector<64x32xf32>
    %39 = vector.extract_strided_slice %6 {offsets = [0, 8], sizes = [64, 8], strides = [1, 1]} : vector<64x96xf32> to vector<64x8xf32>
    %cst_21 = arith.constant 0.353553385 : f32
    %40 = vector.broadcast %cst_21 : f32 to vector<64x8xf32>
    %41 = arith.mulf %39, %40 : vector<64x8xf32>
    %42 = arith.truncf %41 : vector<64x8xf32> to vector<64x8xbf16>
    %43 = vector.extract_strided_slice %6 {offsets = [0, 40], sizes = [64, 8], strides = [1, 1]} : vector<64x96xf32> to vector<64x8xf32>
    %44 = arith.truncf %43 : vector<64x8xf32> to vector<64x8xbf16>
    %45 = vector.extract_strided_slice %6 {offsets = [0, 72], sizes = [64, 8], strides = [1, 1]} : vector<64x96xf32> to vector<64x8xf32>
    %46 = arith.truncf %45 : vector<64x8xf32> to vector<64x8xbf16>
    %cst_22 = arith.constant dense<0.000000e+00> : vector<64x64xf32>
    %47 = tpu.matmul %42, %44, %cst_22 {dimension_numbers = #tpu.dot_dimension_numbers<[1], [1], [0], [0], [0, 0, 1, 0], [], []>} : vector<64x8xbf16>, vector<64x8xbf16>, vector<64x64xf32> -> vector<64x64xf32>
    %c0_23 = arith.constant 0 : index
    %c1 = arith.constant 1 : index
    %c0_24 = arith.constant 0 : index
    %c0_25 = arith.constant 0 : index
    %48 = vector.load %arg5[%c0_23, %c1, %c0_24, %c0_25] : memref<1x4x64x64xf32, #tpu.memory_space<vmem>>, vector<1x1x64x64xf32>
    %49 = vector.shape_cast %48 : vector<1x1x64x64xf32> to vector<64x64xf32>
    %50 = arith.addf %47, %49 : vector<64x64xf32>
    %cst_26 = arith.constant dense<0xFF800000> : vector<64xf32>
    %51 = vector.multi_reduction <maximumf>, %50, %cst_26 [1] : vector<64x64xf32> to vector<64xf32>
    %52 = vector.shape_cast %51 : vector<64xf32> to vector<64x1xf32>
    %53 = vector.broadcast %52 : vector<64x1xf32> to vector<64x64xf32>
    %54 = arith.subf %50, %53 : vector<64x64xf32>
    %55 = math.exp %54 : vector<64x64xf32>
    %cst_27 = arith.constant dense<0.000000e+00> : vector<64xf32>
    %56 = vector.multi_reduction <add>, %55, %cst_27 [1] : vector<64x64xf32> to vector<64xf32>
    %57 = vector.shape_cast %56 : vector<64xf32> to vector<64x1xf32>
    %58 = tpu.reciprocal %57 {approx = true} : vector<64x1xf32> -> vector<64x1xf32>
    %59 = vector.broadcast %58 : vector<64x1xf32> to vector<64x64xf32>
    %60 = arith.mulf %55, %59 : vector<64x64xf32>
    %61 = arith.truncf %60 : vector<64x64xf32> to vector<64x64xbf16>
    %cst_28 = arith.constant dense<0.000000e+00> : vector<64x8xf32>
    %62 = tpu.matmul %61, %46, %cst_28 {dimension_numbers = #tpu.dot_dimension_numbers<[1], [0], [0], [1], [0, 0, 1, 1], [], []>} : vector<64x64xbf16>, vector<64x8xbf16>, vector<64x8xf32> -> vector<64x8xf32>
    %63 = arith.truncf %62 : vector<64x8xf32> to vector<64x8xbf16>
    %c1_29 = arith.constant 1 : index
    %c0_30 = arith.constant 0 : index
    %c0_31 = arith.constant 0 : index
    %64 = vector.load %arg6[%c1_29, %c0_30, %c0_31] : memref<4x8x32xbf16, #tpu.memory_space<vmem>>, vector<1x8x32xbf16>
    %65 = vector.shape_cast %64 : vector<1x8x32xbf16> to vector<8x32xbf16>
    %cst_32 = arith.constant dense<0.000000e+00> : vector<64x32xf32>
    %66 = tpu.matmul %63, %65, %cst_32 {dimension_numbers = #tpu.dot_dimension_numbers<[1], [0], [0], [1], [0, 0, 1, 1], [], []>} : vector<64x8xbf16>, vector<8x32xbf16>, vector<64x32xf32> -> vector<64x32xf32>
    %67 = arith.addf %38, %66 : vector<64x32xf32>
    %68 = vector.extract_strided_slice %6 {offsets = [0, 16], sizes = [64, 8], strides = [1, 1]} : vector<64x96xf32> to vector<64x8xf32>
    %cst_33 = arith.constant 0.353553385 : f32
    %69 = vector.broadcast %cst_33 : f32 to vector<64x8xf32>
    %70 = arith.mulf %68, %69 : vector<64x8xf32>
    %71 = arith.truncf %70 : vector<64x8xf32> to vector<64x8xbf16>
    %72 = vector.extract_strided_slice %6 {offsets = [0, 48], sizes = [64, 8], strides = [1, 1]} : vector<64x96xf32> to vector<64x8xf32>
    %73 = arith.truncf %72 : vector<64x8xf32> to vector<64x8xbf16>
    %74 = vector.extract_strided_slice %6 {offsets = [0, 80], sizes = [64, 8], strides = [1, 1]} : vector<64x96xf32> to vector<64x8xf32>
    %75 = arith.truncf %74 : vector<64x8xf32> to vector<64x8xbf16>
    %cst_34 = arith.constant dense<0.000000e+00> : vector<64x64xf32>
    %76 = tpu.matmul %71, %73, %cst_34 {dimension_numbers = #tpu.dot_dimension_numbers<[1], [1], [0], [0], [0, 0, 1, 0], [], []>} : vector<64x8xbf16>, vector<64x8xbf16>, vector<64x64xf32> -> vector<64x64xf32>
    %c0_35 = arith.constant 0 : index
    %c2 = arith.constant 2 : index
    %c0_36 = arith.constant 0 : index
    %c0_37 = arith.constant 0 : index
    %77 = vector.load %arg5[%c0_35, %c2, %c0_36, %c0_37] : memref<1x4x64x64xf32, #tpu.memory_space<vmem>>, vector<1x1x64x64xf32>
    %78 = vector.shape_cast %77 : vector<1x1x64x64xf32> to vector<64x64xf32>
    %79 = arith.addf %76, %78 : vector<64x64xf32>
    %cst_38 = arith.constant dense<0xFF800000> : vector<64xf32>
    %80 = vector.multi_reduction <maximumf>, %79, %cst_38 [1] : vector<64x64xf32> to vector<64xf32>
    %81 = vector.shape_cast %80 : vector<64xf32> to vector<64x1xf32>
    %82 = vector.broadcast %81 : vector<64x1xf32> to vector<64x64xf32>
    %83 = arith.subf %79, %82 : vector<64x64xf32>
    %84 = math.exp %83 : vector<64x64xf32>
    %cst_39 = arith.constant dense<0.000000e+00> : vector<64xf32>
    %85 = vector.multi_reduction <add>, %84, %cst_39 [1] : vector<64x64xf32> to vector<64xf32>
    %86 = vector.shape_cast %85 : vector<64xf32> to vector<64x1xf32>
    %87 = tpu.reciprocal %86 {approx = true} : vector<64x1xf32> -> vector<64x1xf32>
    %88 = vector.broadcast %87 : vector<64x1xf32> to vector<64x64xf32>
    %89 = arith.mulf %84, %88 : vector<64x64xf32>
    %90 = arith.truncf %89 : vector<64x64xf32> to vector<64x64xbf16>
    %cst_40 = arith.constant dense<0.000000e+00> : vector<64x8xf32>
    %91 = tpu.matmul %90, %75, %cst_40 {dimension_numbers = #tpu.dot_dimension_numbers<[1], [0], [0], [1], [0, 0, 1, 1], [], []>} : vector<64x64xbf16>, vector<64x8xbf16>, vector<64x8xf32> -> vector<64x8xf32>
    %92 = arith.truncf %91 : vector<64x8xf32> to vector<64x8xbf16>
    %c2_41 = arith.constant 2 : index
    %c0_42 = arith.constant 0 : index
    %c0_43 = arith.constant 0 : index
    %93 = vector.load %arg6[%c2_41, %c0_42, %c0_43] : memref<4x8x32xbf16, #tpu.memory_space<vmem>>, vector<1x8x32xbf16>
    %94 = vector.shape_cast %93 : vector<1x8x32xbf16> to vector<8x32xbf16>
    %cst_44 = arith.constant dense<0.000000e+00> : vector<64x32xf32>
    %95 = tpu.matmul %92, %94, %cst_44 {dimension_numbers = #tpu.dot_dimension_numbers<[1], [0], [0], [1], [0, 0, 1, 1], [], []>} : vector<64x8xbf16>, vector<8x32xbf16>, vector<64x32xf32> -> vector<64x32xf32>
    %96 = arith.addf %67, %95 : vector<64x32xf32>
    %97 = vector.extract_strided_slice %6 {offsets = [0, 24], sizes = [64, 8], strides = [1, 1]} : vector<64x96xf32> to vector<64x8xf32>
    %cst_45 = arith.constant 0.353553385 : f32
    %98 = vector.broadcast %cst_45 : f32 to vector<64x8xf32>
    %99 = arith.mulf %97, %98 : vector<64x8xf32>
    %100 = arith.truncf %99 : vector<64x8xf32> to vector<64x8xbf16>
    %101 = vector.extract_strided_slice %6 {offsets = [0, 56], sizes = [64, 8], strides = [1, 1]} : vector<64x96xf32> to vector<64x8xf32>
    %102 = arith.truncf %101 : vector<64x8xf32> to vector<64x8xbf16>
    %103 = vector.extract_strided_slice %6 {offsets = [0, 88], sizes = [64, 8], strides = [1, 1]} : vector<64x96xf32> to vector<64x8xf32>
    %104 = arith.truncf %103 : vector<64x8xf32> to vector<64x8xbf16>
    %cst_46 = arith.constant dense<0.000000e+00> : vector<64x64xf32>
    %105 = tpu.matmul %100, %102, %cst_46 {dimension_numbers = #tpu.dot_dimension_numbers<[1], [1], [0], [0], [0, 0, 1, 0], [], []>} : vector<64x8xbf16>, vector<64x8xbf16>, vector<64x64xf32> -> vector<64x64xf32>
    %c0_47 = arith.constant 0 : index
    %c3 = arith.constant 3 : index
    %c0_48 = arith.constant 0 : index
    %c0_49 = arith.constant 0 : index
    %106 = vector.load %arg5[%c0_47, %c3, %c0_48, %c0_49] : memref<1x4x64x64xf32, #tpu.memory_space<vmem>>, vector<1x1x64x64xf32>
    %107 = vector.shape_cast %106 : vector<1x1x64x64xf32> to vector<64x64xf32>
    %108 = arith.addf %105, %107 : vector<64x64xf32>
    %cst_50 = arith.constant dense<0xFF800000> : vector<64xf32>
    %109 = vector.multi_reduction <maximumf>, %108, %cst_50 [1] : vector<64x64xf32> to vector<64xf32>
    %110 = vector.shape_cast %109 : vector<64xf32> to vector<64x1xf32>
    %111 = vector.broadcast %110 : vector<64x1xf32> to vector<64x64xf32>
    %112 = arith.subf %108, %111 : vector<64x64xf32>
    %113 = math.exp %112 : vector<64x64xf32>
    %cst_51 = arith.constant dense<0.000000e+00> : vector<64xf32>
    %114 = vector.multi_reduction <add>, %113, %cst_51 [1] : vector<64x64xf32> to vector<64xf32>
    %115 = vector.shape_cast %114 : vector<64xf32> to vector<64x1xf32>
    %116 = tpu.reciprocal %115 {approx = true} : vector<64x1xf32> -> vector<64x1xf32>
    %117 = vector.broadcast %116 : vector<64x1xf32> to vector<64x64xf32>
    %118 = arith.mulf %113, %117 : vector<64x64xf32>
    %119 = arith.truncf %118 : vector<64x64xf32> to vector<64x64xbf16>
    %cst_52 = arith.constant dense<0.000000e+00> : vector<64x8xf32>
    %120 = tpu.matmul %119, %104, %cst_52 {dimension_numbers = #tpu.dot_dimension_numbers<[1], [0], [0], [1], [0, 0, 1, 1], [], []>} : vector<64x64xbf16>, vector<64x8xbf16>, vector<64x8xf32> -> vector<64x8xf32>
    %121 = arith.truncf %120 : vector<64x8xf32> to vector<64x8xbf16>
    %c3_53 = arith.constant 3 : index
    %c0_54 = arith.constant 0 : index
    %c0_55 = arith.constant 0 : index
    %122 = vector.load %arg6[%c3_53, %c0_54, %c0_55] : memref<4x8x32xbf16, #tpu.memory_space<vmem>>, vector<1x8x32xbf16>
    %123 = vector.shape_cast %122 : vector<1x8x32xbf16> to vector<8x32xbf16>
    %cst_56 = arith.constant dense<0.000000e+00> : vector<64x32xf32>
    %124 = tpu.matmul %121, %123, %cst_56 {dimension_numbers = #tpu.dot_dimension_numbers<[1], [0], [0], [1], [0, 0, 1, 1], [], []>} : vector<64x8xbf16>, vector<8x32xbf16>, vector<64x32xf32> -> vector<64x32xf32>
    %125 = arith.addf %96, %124 : vector<64x32xf32>
    %c0_57 = arith.constant 0 : index
    %c0_58 = arith.constant 0 : index
    %c0_59 = arith.constant 0 : index
    %126 = vector.load %arg8[%c0_57, %c0_58, %c0_59] : memref<1x64x32xf32, #tpu.memory_space<vmem>>, vector<1x64x32xf32>
    %127 = vector.shape_cast %126 : vector<1x64x32xf32> to vector<64x32xf32>
    %128 = vector.shape_cast %125 : vector<64x32xf32> to vector<1x64x32xf32>
    tpu.vector_store %arg8[%c0_57, %c0_58, %c0_59], %128 {strides = array<i32>} : memref<1x64x32xf32, #tpu.memory_space<vmem>>, vector<1x64x32xf32>,
    return
  }
  func.func @transform_0(%arg0: i32, %arg1: i32) -> (i32, i32, i32) {
    %c0_i32 = arith.constant 0 : i32
    %c0_i32_0 = arith.constant 0 : i32
    return %arg0, %arg1, %c0_i32 : i32, i32, i32
  }
  func.func @transform_1(%arg0: i32, %arg1: i32) -> (i32, i32) {
    %c0_i32 = arith.constant 0 : i32
    %c0_i32_0 = arith.constant 0 : i32
    %c0_i32_1 = arith.constant 0 : i32
    return %c0_i32, %c0_i32_0 : i32, i32
  }
  func.func @transform_2(%arg0: i32, %arg1: i32) -> (i32, i32) {
    %c0_i32 = arith.constant 0 : i32
    %c0_i32_0 = arith.constant 0 : i32
    %c0_i32_1 = arith.constant 0 : i32
    return %c0_i32, %c0_i32_0 : i32, i32
  }
  func.func @transform_3(%arg0: i32, %arg1: i32) -> (i32, i32, i32, i32) {
    %c0_i32 = arith.constant 0 : i32
    %c0_i32_0 = arith.constant 0 : i32
    %c0_i32_1 = arith.constant 0 : i32
    %c0_i32_2 = arith.constant 0 : i32
    return %arg1, %c0_i32, %c0_i32_0, %c0_i32_1 : i32, i32, i32, i32
  }
  func.func @transform_4(%arg0: i32, %arg1: i32) -> (i32, i32, i32) {
    %c0_i32 = arith.constant 0 : i32
    %c0_i32_0 = arith.constant 0 : i32
    %c0_i32_1 = arith.constant 0 : i32
    %c0_i32_2 = arith.constant 0 : i32
    return %c0_i32, %c0_i32_0, %c0_i32_1 : i32, i32, i32
  }
  func.func @transform_5(%arg0: i32, %arg1: i32) -> (i32, i32) {
    %c0_i32 = arith.constant 0 : i32
    %c0_i32_0 = arith.constant 0 : i32
    %c0_i32_1 = arith.constant 0 : i32
    return %c0_i32, %c0_i32_0 : i32, i32
  }
  func.func @transform_6(%arg0: i32, %arg1: i32) -> (i32, i32, i32) {
    %c0_i32 = arith.constant 0 : i32
    %c0_i32_0 = arith.constant 0 : i32
    return %arg0, %arg1, %c0_i32 : i32, i32, i32
  }
}

</mosaic_0001>

<bundles_post_ra>
// kernel: tpu_custom_call.1
= control target key start
LH: loop header
LB: loop body
LE: loop exit
PB: predicated region body
PF: predicated region fallthrough
CT: control target
= control target key end

     0   :  { %11 = vsyncpa [#allocation3], 0  ;;  %s2820_s21 = smov 0   ;;  %s2822_s22 = smov 0   ;;  %s3400_s0 = inlined_call_operand.vmem [shape: bf16[2,64,32], index: 0, kind: input, shape index: {}]   ;;  %s3401_s1 = inlined_call_operand.vmem [shape: bf16[32,96], index: 1, kind: input, shape index: {}]   ;;  %s3402_s2 = inlined_call_operand.vmem [shape: f32[1,96], index: 2, kind: input, shape index: {}]   ;;  %s3403_s3 = inlined_call_operand.hbm [shape: f32[1,4,64,64], index: 3, kind: input, shape index: {}]   ;;  %s3404_s4 = inlined_call_operand.vmem [shape: bf16[4,8,32], index: 4, kind: input, shape index: {}]   ;;  %s3405_s5 = inlined_call_operand.vmem [shape: f32[1,32], index: 5, kind: input, shape index: {}]   ;;  %s3406_s6 = inlined_call_operand.vmem [shape: f32[2,64,32], index: 6, kind: output, shape index: {}]  }
   0x1   :  { %s2824_s23 = smov 0  }
   0x2 LB: > { %s2133_s24 = sadd.s32 4294967295, %s2769_s23   ;;  %s29_s25 = sadd.s32 1, %s2765_s22  ;;  %s2769_s23 = sphi %s2824_s23, %s17_s23   ;;  %s2765_s22 = sphi %s2822_s22, %s3416_s22   ;;  %s2761_s21 = sphi %s2820_s21, %s3415_s21  }
   0x3   : > { %p31_p0 = scmp.ge.s32.totalorder %s29_s25, 2  ;;  %p2135_p1 = scmp.ge.s32.totalorder %s2769_s23, 1 }
   0x4   : > { %p200_p2 = scmp.lt.s32.totalorder %s2769_s23, 3  ;;  %p2845_p4 = scmp.eq.s32.totalorder %s2133_s24, 0 }
   0x5   : > { %s3418_s25 = smov (%p31_p0, %s29_s25), 0  ;;  %s2771_s28 = smov [#allocation2]  }
   0x6   : > { %p2841_p3 = pnand %p2135_p1, %p200_p2  ;;  %s221_s29 = sshll.u32 %s2771_s28, 4  ;;  %s222_s29 = int_to_ptr.vmem [resolvable:$true] %s221_s29 }
   0x7   : > { %s3411_s27 = scalar_select %p2845_p4, 1, 0 }
   0x8   : > { %s3410_s26 = scalar_select %p2841_p3, 1, 0 }
   0x9   : > { %p2537_p5 = pneg %p2841_p3  ;;  %s2715_s9 = scalar_lea.hbm %s3403_s3, 4096 }
   0xa   : > { %p2716_p7 = scmp.ne.s32.totalorder %s3403_s3, %s2715_s9  ;;  %p2722_p11 = scmp.lt.u32.totalorder %s2715_s9, %s3403_s3 }
   0xb   : > { %p2853_p6 = pnand %p2845_p4, %p2537_p5 }
   0xd   : > { %p2717_p8 = pneg %p2853_p6 }
   0xf   : > { %p2718_p9 = pnand %p2717_p8, %p2716_p7 }
  0x11   : > { %p2719_p10 = pneg %p2718_p9 }
  0x13   : > { %p2724_p12 = pnand %p2722_p11, %p2719_p10 }
  0x15   : > { %2727 = shalt.err (!%p2724_p12)
}
  0x16   : > { %s2728_s14 = scalar_lea.vmem %s222_s29, 4096  ;;  %p2736_p2 = scmp.lt.s32.totalorder %s222_s29, %s222_s29 }
  0x17   : > { %p2729_p13 = scmp.ne.s32.totalorder %s222_s29, %s2728_s14  ;;  %p2737_p5 = scmp.lt.s32.totalorder %s2728_s14, %s2728_s14 }
  0x19   : > { %p2731_p0 = pnand %p2729_p13, %p2717_p8  ;;  %p2738_p4 = por %p2737_p5, %p2736_p2 }
  0x1b   : > { %p2732_p1 = pneg %p2731_p0 }
  0x1d   : > { %p2739_p3 = pnand %p2738_p4, %p2732_p1 }
  0x1f   : > { %2742 = shalt.err (!%p2739_p3)
}
  0x20   : > { %s2772_s15 = smov 128   ;;  %s2773_s16 = smov 8  }
  0x21   : > { %2540 = dma.hbm_to_vmem [thread:$0]  (!%p2853_p6), %s3403_s3, 4096, %s222_s29, [#allocation3], %s2772_s15, %s2772_s15, %s2773_s16  }
  0x22   : > { %p3413_p7 = scmp.ne.s32.totalorder %s3410_s26, 0 }
  0x23   : > { %p3414_p9 = scmp.ne.s32.totalorder (!%p3413_p7), %s3411_s27, 0 }
  0x24   : > { %256 = sbr.rel (%p3413_p7) target bundleno = 2241 (0x8c1), region = 44 }
  0x2b   : > { %2756 = dma.done.wait (%p3414_p9), [#allocation3], 4096  }
  0x2c   : > { %2758 = vsyncadd (%p3414_p9), [#allocation3], 4294963200  ;;  %p295_p3 = scmp.lt.s32.totalorder %s2761_s21, 1  ;;  %v2581_v0 = vld [vmem:[%s3401_s1] sm:$0xff]   ;;  %v2582_v1 = vld [vmem:[%s3401_s1 + $0x8] sm:$0xff]   ;;  %vm366_vm0 = vcmask 261120  }
  0x2d   : > { %2301 = vmatprep.subr.bf16.mxu0 %v2581_v0  ;;  %v2144_v6 = vld [vmem:[%s3402_s2] ss:$0 sm:$0xff]  ;;  %vm487_vm1 = vcmask 64512   ;;  %s2774_s9 = smov 96   ;;  %s2775_s10 = smov 88   ;;  %v469_v61 = vld [vmem:[#allocation2 + $0x10] sm:$0xff] }
  0x2e   : > { %s3420_s21 = smov (!%p295_p3, %s2761_s21), 1  ;;  %2302 = vmatpush3.bf16.msra.mxu0 %v2581_v0  ;;  %s2776_s11 = smov 120   ;;  %v467_v59 = vld [vmem:[#allocation2] sm:$0xff]  ;;  %v468_v63 = vld [vmem:[#allocation2 + $0x8] sm:$0xff]  ;;  %vm577_vm2 = vcmask 523264   ;;  %vm776_vm3 = vcmask 1043456  }
  0x2f   : > { %s2209_s19 = sshll.u32 %s3420_s21, 5  ;;  %2303 = vmatprep.subr.bf16.mxu0 %v2582_v1  ;;  %s2777_s12 = smov 64  }
  0x30   : > { %s302_s28 = scalar_lea.vmem %s3400_s0, %s2209_s19  ;;  %s2778_s13 = smov 80  }
  0x31   : > { %v2583_v2 = vld [vmem:[%s302_s28] sm:$0xff]   ;;  %v2584_v3 = vld [vmem:[%s302_s28 + $0x8] sm:$0xff]   ;;  %v2585_v4 = vld [vmem:[%s302_s28 + $0x10] sm:$0xff]   ;;  %s2779_s14 = smov 112   ;;  %s2780_s15 = smov 56  }
  0x32   : > { %2305 = vmatprep.mubr.msk.bf16.mxu0 %vm366_vm0, %v2583_v2  ;;  %2304 = vmatpush3.bf16.msra.mxu0 %v2582_v1  ;;  %v2586_v5 = vld [vmem:[%s302_s28 + $0x18] sm:$0xff]   ;;  %s2781_s18 = smov 72   ;;  %s2782_s19 = smov 104  }
  0x33   : > { %s2783_s28 = smov 48   ;;  %s2784_s29 = smov 40  }
  0x34   : > { %s2210_s8 = sshll.u32 %s3420_s21, 6 }
  0x35   : > { %2306 = vmatmul.mubr.msk.bf16.vlgmr.msra.gmra.mrb[0].mxu0 %vm366_vm0, %v2584_v3 }
  0x36   : > { %2309 = vmatprep.mubr.msk.bf16.mxu0 %vm366_vm0, %v2585_v4 }
  0x3d   : > { %2310 = vmatmul.mubr.msk.bf16.gmra.mrb[4].mxu0 %vm366_vm0, %v2586_v5 }
 0x108   : > { %v2307_v7 = vpop.f32.mrb[0].mxu0 }
 0x109   : > { %v422_v8 = vadd.f32 %v2307_v7, %v2144_v6  ;;  %v413_v9 = vpop.f32.mrb[1].mxu0 }
 0x10a   : > { %v414_v10 = vadd.f32 %v2144_v6, %v413_v9  ;;  %v2308_v11 = vpop.f32.mrb[2].mxu0 }
 0x10b   : > { %v425_v12 = vadd.f32 %v2308_v11, %v2144_v6  ;;  %v416_v13 = vpop.f32.mrb[3].mxu0  ;;  %v453_v15 = vmul.f32 0.35355338, %v422_v8 }
 0x10c   : > { %v417_v14 = vadd.f32 %v2144_v6, %v416_v13  ;;  %v451_v18 = vmul.f32 0.35355338, %v414_v10 }
 0x10d   : > { %v454_v16 = vmul.f32 0.35355338, %v425_v12  ;;  %v2900_v17 = vpack.c.bf16 %v425_v12, %v422_v8  ;;  %v471_v8 = vld [vmem:[#allocation2 + $0x20] sm:$0xff]  ;;  %v473_v12 = vld [vmem:[#allocation2 + $0x30] sm:$0xff] }
 0x10e   : > { %v452_v19 = vmul.f32 0.35355338, %v417_v14  ;;  %v2902_v20 = vpack.c.bf16 %v417_v14, %v414_v10  ;;  %v472_v14 = vld [vmem:[#allocation2 + $0x28] sm:$0xff] }
 0x10f   : > { %v2904_v21 = vpack.c.bf16 %v454_v16, %v453_v15 }
 0x110   : > { %v2906_v22 = vpack.c.bf16 %v452_v19, %v451_v18  ;;  %v2311_v23 = vpop.f32.mrb[4].mxu0  ;;  %479 = vrot.lane.b32.xlu0 %v2902_v20, %s2774_s9 }
 0x111   : > { %v438_v24 = vadd.f32 %v2311_v23, %v2144_v6  ;;  %v429_v25 = vpop.f32.mrb[5].mxu0 }
 0x112   : > { %v430_v26 = vadd.f32 %v2144_v6, %v429_v25  ;;  %v2312_v27 = vpop.f32.mrb[6].mxu0  ;;  %2321 = vmatprep.mubr.msk.bf16.mxu1 %vm487_vm1, %v2906_v22 }
 0x113   : > { %v457_v28 = vmul.f32 0.35355338, %v438_v24  ;;  %v441_v29 = vadd.f32 %v2312_v27, %v2144_v6  ;;  %v432_v30 = vpop.f32.mrb[7].mxu0 }
 0x114   : > { %v455_v31 = vmul.f32 0.35355338, %v430_v26  ;;  %v433_v32 = vadd.f32 %v2144_v6, %v432_v30  ;;  %481 = vrot.lane.b32.xlu0 %v2900_v17, %s2774_s9  ;;  %v470_v6 = vld [vmem:[#allocation2 + $0x18] sm:$0xff] }
 0x115   : > { %v458_v33 = vmul.f32 0.35355338, %v441_v29  ;;  %v2912_v34 = vpack.c.bf16 %v441_v29, %v438_v24 }
 0x116   : > { %v456_v35 = vmul.f32 0.35355338, %v433_v32  ;;  %v2914_v36 = vpack.c.bf16 %v433_v32, %v430_v26  ;;  %v474_v26 = vld [vmem:[#allocation2 + $0x38] sm:$0xff] }
 0x117   : > { %v2916_v37 = vpack.c.bf16 %v458_v33, %v457_v28 }
 0x118   : > { %v2918_v38 = vpack.c.bf16 %v456_v35, %v455_v31  ;;  %483 = vrot.lane.b32.xlu1 %v2914_v36, %s2774_s9  ;;  %874 = vrot.lane.b32.xlu0 %v2902_v20, %s2775_s10 }
 0x11c   : > { %485 = vrot.lane.b32.xlu1 %v2912_v34, %s2774_s9  ;;  %878 = vrot.lane.b32.xlu0 %v2914_v36, %s2775_s10 }
 0x120   : > { %876 = vrot.lane.b32.xlu1 %v2900_v17, %s2775_s10  ;;  %866 = vrot.lane.b32.xlu0 %v2906_v22, %s2776_s11 }
 0x124   : > { %880 = vrot.lane.b32.xlu1 %v2912_v34, %s2775_s10  ;;  %870 = vrot.lane.b32.xlu0 %v2918_v38, %s2776_s11 }
 0x128   : > { %868 = vrot.lane.b32.xlu1 %v2904_v21, %s2776_s11 }
 0x12c   : > { %872 = vrot.lane.b32.xlu1 %v2916_v37, %s2776_s11 }
 0x182   : > { %v480_v39 = vpop.permute.xlu0 %479 }
 0x183   : > { %2513 = vmatprep.subr.msk.bf16.mxu1 %vm487_vm1, %v480_v39  ;;  %v501_v40 = vsel %vm487_vm1, %v480_v39, 0 }
 0x184   : > { %2314 = vmatpush3.bf16.xpose.msra.mxu1 %v501_v40 }
 0x186   : > { %v482_v41 = vpop.permute.xlu0 %481 }
 0x187   : > { %2514 = vmatprep.subr.msk.bf16.mxu1 %vm487_vm1, %v482_v41  ;;  %v504_v42 = vsel %vm487_vm1, %v482_v41, 0 }
 0x18a   : > { %v484_v43 = vpop.permute.xlu1 %483  ;;  %v875_v47 = vpop.permute.xlu0 %874 }
 0x18b   : > { %v507_v44 = vsel %vm487_vm1, %v484_v43, 0  ;;  %v895_v48 = vsel %vm487_vm1, %v875_v47, 0 }
 0x18c   : > { %2316 = vmatpush3.bf16.xpose.msra.mxu1 %v504_v42 }
 0x18d   : > { %2515 = vmatprep.subr.msk.bf16.mxu1 %vm487_vm1, %v484_v43 }
 0x18e   : > { %v486_v45 = vpop.permute.xlu1 %485  ;;  %v879_v50 = vpop.permute.xlu0 %878 }
 0x18f   : > { %v510_v46 = vsel %vm487_vm1, %v486_v45, 0  ;;  %v901_v53 = vsel %vm487_vm1, %v879_v50, 0 }
 0x192   : > { %v877_v49 = vpop.permute.xlu1 %876  ;;  %v867_v51 = vpop.permute.xlu0 %866 }
 0x193   : > { %v898_v52 = vsel %vm487_vm1, %v877_v49, 0 }
 0x194   : > { %2318 = vmatpush3.bf16.xpose.msra.mxu1 %v507_v44 }
 0x195   : > { %2516 = vmatprep.subr.msk.bf16.mxu1 %vm487_vm1, %v486_v45 }
 0x196   : > { %v881_v54 = vpop.permute.xlu1 %880  ;;  %v871_v57 = vpop.permute.xlu0 %870 }
 0x197   : > { %v904_v55 = vsel %vm487_vm1, %v881_v54, 0 }
 0x19a   : > { %v869_v56 = vpop.permute.xlu1 %868 }
 0x19c   : > { %2320 = vmatpush3.bf16.xpose.msra.mxu1 %v510_v46 }
 0x19d   : > { %2518 = vmatprep.subr.msk.bf16.mxu1 %vm487_vm1, %v875_v47 }
 0x19e   : > { %v873_v58 = vpop.permute.xlu1 %872 }
 0x1a3   : > { %2322 = vmatmul.mubr.msk.bf16.vlgmr.msra.gmra.mrb[0].mxu1 %vm487_vm1, %v2904_v21 }
 0x1a4   : > { %2325 = vmatprep.mubr.msk.bf16.mxu1 %vm487_vm1, %v2918_v38  ;;  %2356 = vmatpush3.bf16.xpose.msra.mxu1 %v895_v48 }
 0x1a5   : > { %2519 = vmatprep.subr.msk.bf16.mxu1 %vm487_vm1, %v877_v49 }
 0x1ab   : > { %2326 = vmatmul.mubr.msk.bf16.gmra.mrb[4].mxu1 %vm487_vm1, %v2916_v37 }
 0x1ac   : > { %2358 = vmatpush3.bf16.xpose.msra.mxu1 %v898_v52  ;;  %2363 = vmatprep.mubr.msk.bf16.mxu1 %vm487_vm1, %v867_v51 }
 0x1ad   : > { %2520 = vmatprep.subr.msk.bf16.mxu1 %vm487_vm1, %v879_v50 }
 0x1b4   : > { %2360 = vmatpush3.bf16.xpose.msra.mxu1 %v901_v53 }
 0x1b5   : > { %2521 = vmatprep.subr.msk.bf16.mxu1 %vm487_vm1, %v881_v54 }
 0x1bc   : > { %2362 = vmatpush3.bf16.xpose.msra.mxu1 %v904_v55 }
 0x1c3   : > { %2364 = vmatmul.mubr.msk.bf16.vlgmr.msra.gmra.mrb[8].mxu1 %vm487_vm1, %v869_v56 }
 0x1c4   : > { %2367 = vmatprep.mubr.msk.bf16.mxu1 %vm487_vm1, %v871_v57 }
 0x1cb   : > { %2368 = vmatmul.mubr.msk.bf16.gmra.mrb[12].mxu1 %vm487_vm1, %v873_v58 }
 0x276   : > { %v2323_v60 = vpop.f32.mrb[0].mxu1 }
 0x277   : > { %v546_v62 = vpop.f32.mrb[1].mxu1  ;;  %v555_v3 = vadd.f32 %v2323_v60, %v469_v61 }
 0x278   : > { %v547_v0 = vadd.f32 %v546_v62, %v467_v59  ;;  %v2324_v1 = vpop.f32.mrb[2].mxu1 }
 0x279   : > { %v549_v2 = vpop.f32.mrb[3].mxu1  ;;  %v558_v9 = vadd.f32 %v2324_v1, %v470_v6  ;;  %v584_v11 = vsel %vm577_vm2, %v555_v3, -inf }
 0x27a   : > { %v550_v4 = vadd.f32 %v549_v2, %v468_v63  ;;  %v578_v5 = vsel %vm577_vm2, %v547_v0, -inf }
 0x27b   : > { %579 = vmax.xlane.f32.xlu0 %v578_v5  ;;  %v587_v25 = vsel %vm577_vm2, %v558_v9, -inf }
 0x27c   : > { %v581_v7 = vsel %vm577_vm2, %v550_v4, -inf }
 0x27d   : > { %582 = vmax.xlane.f32.xlu1 %v581_v7 }
 0x27e   : > { %v2327_v10 = vpop.f32.mrb[4].mxu1 }
 0x27f   : > { %v562_v13 = vpop.f32.mrb[5].mxu1  ;;  %585 = vmax.xlane.f32.xlu0 %v584_v11  ;;  %v571_v19 = vadd.f32 %v2327_v10, %v473_v12 }
 0x280   : > { %v563_v15 = vadd.f32 %v562_v13, %v471_v8  ;;  %v2328_v16 = vpop.f32.mrb[6].mxu1 }
 0x281   : > { %v565_v18 = vpop.f32.mrb[7].mxu1  ;;  %v574_v27 = vadd.f32 %v2328_v16, %v474_v26  ;;  %v596_v28 = vsel %vm577_vm2, %v571_v19, -inf }
 0x282   : > { %v566_v23 = vadd.f32 %v565_v18, %v472_v14  ;;  %v590_v24 = vsel %vm577_vm2, %v563_v15, -inf }
 0x283   : > { %591 = vmax.xlane.f32.xlu1 %v590_v24  ;;  %588 = vmax.xlane.f32.xlu0 %v587_v25  ;;  %v599_v30 = vsel %vm577_vm2, %v574_v27, -inf  ;;  %v855_v24 = vld [vmem:[#allocation2 + $0x48] sm:$0xff]  ;;  %v854_v25 = vld [vmem:[#allocation2 + $0x40] sm:$0xff] }
 0x284   : > { %v593_v29 = vsel %vm577_vm2, %v566_v23, -inf }
 0x287   : > { %597 = vmax.xlane.f32.xlu1 %v596_v28  ;;  %594 = vmax.xlane.f32.xlu0 %v593_v29  ;;  %v858_v28 = vld [vmem:[#allocation2 + $0x60] sm:$0xff]  ;;  %v856_v29 = vld [vmem:[#allocation2 + $0x50] sm:$0xff] }
 0x28b   : > { %600 = vmax.xlane.f32.xlu0 %v599_v30 }
 0x296   : > { %v2964_v31 = vpop.f32.mrb[8].mxu1 }
 0x297   : > { %v2966_v32 = vpop.f32.mrb[9].mxu1 }
 0x298   : > { %v2968_v33 = vpop.f32.mrb[10].mxu1  ;;  %670 = vrot.lane.b32.xlu1 %v2902_v20, %s2777_s12 }
 0x299   : > { %v2972_v35 = vpop.f32.mrb[11].mxu1 }
 0x29a   : > { %v3029_v26 = vadd.f32 %v2972_v35, %v855_v24  ;;  %v763_v24 = vld [vmem:[%s3404_s4] sm:$0xf] }
 0x29e   : > { %v2974_v39 = vpop.f32.mrb[12].mxu1 }
 0x29f   : > { %v2976_v40 = vpop.f32.mrb[13].mxu1 }
 0x2a0   : > { %v2978_v41 = vpop.f32.mrb[14].mxu1  ;;  %v3035_v30 = vadd.f32 %v2976_v40, %v858_v28 }
 0x2a1   : > { %v2980_v42 = vpop.f32.mrb[15].mxu1 }
 0x2a2   : > { %v983_v40 = vsel %vm577_vm2, %v3035_v30, -inf }
 0x308   : > { %v580_v43 = vpop.xlane.xlu0 %579 }
 0x309   : > { %v602_v44 = vsub.f32 %v547_v0, %v580_v43  ;;  %v974_v43 = vsel %vm577_vm2, %v3029_v26, -inf }
 0x30a   : > { %v583_v45 = vpop.xlane.xlu1 %582 }
 0x30b   : > { %v610_v48 = vmul.f32 1.442695, %v602_v44  ;;  %v603_v50 = vsub.f32 %v550_v4, %v583_v45  ;;  %v3040_v44 = vadd.f32 %v2964_v31, %v856_v29  ;;  %v860_v45 = vld [vmem:[#allocation2 + $0x70] sm:$0xff] }
 0x30c   : > { %v586_v46 = vpop.xlane.xlu0 %585 }
 0x30d   : > { %v604_v47 = vsub.f32 %v555_v3, %v586_v46  ;;  %v612_v56 = vmul.f32 1.442695, %v603_v50  ;;  %v857_v46 = vld [vmem:[#allocation2 + $0x58] sm:$0xff]  ;;  %v977_v31 = vsel %vm577_vm2, %v3040_v44, -inf }
 0x30f   : > { %v614_v49 = vmul.f32 1.442695, %v604_v47  ;;  %v3050_v47 = vadd.f32 %v2968_v33, %v857_v46 }
 0x310   : > { %v592_v51 = vpop.xlane.xlu1 %591  ;;  %v589_v52 = vpop.xlane.xlu0 %588 }
 0x311   : > { %2587 = vpow2.f32 %v614_v49  ;;  %v605_v53 = vsub.f32 %v558_v9, %v589_v52  ;;  %v606_v54 = vsub.f32 %v563_v15, %v592_v51  ;;  %v861_v51 = vld [vmem:[#allocation2 + $0x78] sm:$0xff] }
 0x312   : > { %2589 = vpow2.f32 %v610_v48  ;;  %v859_v48 = vld [vmem:[#allocation2 + $0x68] sm:$0xff]  ;;  %v3062_v33 = vadd.f32 %v2978_v41, %v861_v51 }
 0x313   : > { %v616_v55 = vmul.f32 1.442695, %v605_v53  ;;  %v618_v60 = vmul.f32 1.442695, %v606_v54  ;;  %v3057_v50 = vadd.f32 %v2980_v42, %v859_v48 }
 0x314   : > { %v598_v57 = vpop.xlane.xlu1 %597  ;;  %v595_v58 = vpop.xlane.xlu0 %594  ;;  %v992_v53 = vsel %vm577_vm2, %v3062_v33, -inf }
 0x315   : > { %v608_v59 = vsub.f32 %v571_v19, %v598_v57  ;;  %2591 = vpow2.f32 %v616_v55  ;;  %v607_v62 = vsub.f32 %v566_v23, %v595_v58  ;;  %v986_v52 = vsel %vm577_vm2, %v3057_v50, -inf }
 0x316   : > { %2593 = vpow2.f32 %v612_v56 }
 0x317   : > { %v622_v61 = vmul.f32 1.442695, %v608_v59  ;;  %v620_v4 = vmul.f32 1.442695, %v607_v62 }
 0x318   : > { %v671_v63 = vpop.permute.xlu1 %670  ;;  %v601_v0 = vpop.xlane.xlu0 %600 }
 0x319   : > { %2595 = vpow2.f32 %v622_v61  ;;  %v609_v1 = vsub.f32 %v574_v27, %v601_v0  ;;  %2329 = vmatprep.subr.bf16.mxu0 %v671_v63  ;;  %v3032_v27 = vadd.f32 %v2966_v32, %v854_v25  ;;  %v3045_v32 = vadd.f32 %v2974_v39, %v860_v45 }
 0x31a   : > { %2330 = vmatpush3.bf16.msra.mxu0 %v671_v63  ;;  %2597 = vpow2.f32 %v618_v60  ;;  %v980_v39 = vsel %vm577_vm2, %v3050_v47, -inf }
 0x31b   : > { %v2982_v2 = vpop.eup %2587  ;;  %v624_v3 = vmul.f32 1.442695, %v609_v1  ;;  %v971_v35 = vsel %vm577_vm2, %v3032_v27, -inf  ;;  %v989_v49 = vsel %vm577_vm2, %v3045_v32, -inf }
 0x31c   : > { %v632_v5 = vsel %vm577_vm2, %v2982_v2, 0.0  ;;  %v2986_v6 = vpop.eup %2589 }
 0x31d   : > { %2599 = vpow2.f32 %v624_v3  ;;  %633 = vadd.xlane.f32.xlu1 %v632_v5  ;;  %v626_v8 = vsel %vm577_vm2, %v2986_v6, 0.0 }
 0x31e   : > { %2601 = vpow2.f32 %v620_v4 }
 0x31f   : > { %v2988_v7 = vpop.eup %2591 }
 0x320   : > { %v635_v9 = vsel %vm577_vm2, %v2988_v7, 0.0  ;;  %v2994_v10 = vpop.eup %2593 }
 0x321   : > { %627 = vadd.xlane.f32.xlu1 %v626_v8  ;;  %636 = vadd.xlane.f32.xlu0 %v635_v9  ;;  %v629_v14 = vsel %vm577_vm2, %v2994_v10, 0.0 }
 0x323   : > { %v2996_v11 = vpop.eup %2595 }
 0x324   : > { %v644_v12 = vsel %vm577_vm2, %v2996_v11, 0.0  ;;  %v3000_v13 = vpop.eup %2597 }
 0x325   : > { %645 = vadd.xlane.f32.xlu1 %v644_v12  ;;  %630 = vadd.xlane.f32.xlu0 %v629_v14  ;;  %v638_v16 = vsel %vm577_vm2, %v3000_v13, 0.0 }
 0x327   : > { %v3004_v15 = vpop.eup %2599 }
 0x328   : > { %v647_v18 = vsel %vm577_vm2, %v3004_v15, 0.0  ;;  %v3010_v19 = vpop.eup %2601 }
 0x329   : > { %639 = vadd.xlane.f32.xlu1 %v638_v16  ;;  %648 = vadd.xlane.f32.xlu0 %v647_v18  ;;  %v641_v23 = vsel %vm577_vm2, %v3010_v19, 0.0 }
 0x32d   : > { %642 = vadd.xlane.f32.xlu0 %v641_v23 }
 0x33a   : > { %674 = vrot.lane.b32.xlu1 %v2914_v36, %s2777_s12 }
 0x33e   : > { %676 = vrot.lane.b32.xlu1 %v2912_v34, %s2777_s12 }
 0x342   : > { %1265 = vrot.lane.b32.xlu1 %v2900_v17, %s2778_s13 }
 0x343   : > { %672 = vrot.lane.b32.xlu0 %v2900_v17, %s2777_s12 }
 0x346   : > { %1269 = vrot.lane.b32.xlu1 %v2912_v34, %s2778_s13 }
 0x347   : > { %1263 = vrot.lane.b32.xlu0 %v2902_v20, %s2778_s13 }
 0x34a   : > { %1257 = vrot.lane.b32.xlu1 %v2904_v21, %s2779_s14 }
 0x34b   : > { %1267 = vrot.lane.b32.xlu0 %v2914_v36, %s2778_s13  ;;  %s312_s13 = scalar_lea.vmem %s3406_s6, %s2210_s8 }
 0x34e   : > { %1261 = vrot.lane.b32.xlu1 %v2916_v37, %s2779_s14 }
 0x34f   : > { %1255 = vrot.lane.b32.xlu0 %v2906_v22, %s2779_s14 }
 0x353   : > { %1259 = vrot.lane.b32.xlu0 %v2918_v38, %s2779_s14 }
 0x372   : > { %975 = vmax.xlane.f32.xlu1 %v974_v43  ;;  %972 = vmax.xlane.f32.xlu0 %v971_v35  ;;  %v778_v35 = vsel %vm776_vm3, %v763_v24, 0 }
 0x376   : > { %984 = vmax.xlane.f32.xlu1 %v983_v40  ;;  %978 = vmax.xlane.f32.xlu0 %v977_v31 }
 0x37a   : > { %990 = vmax.xlane.f32.xlu1 %v989_v49  ;;  %981 = vmax.xlane.f32.xlu0 %v980_v39 }
 0x37e   : > { %987 = vmax.xlane.f32.xlu0 %v986_v52 }
 0x382   : > { %993 = vmax.xlane.f32.xlu0 %v992_v53 }
 0x38b   : > { %1063 = vrot.lane.b32.xlu1 %v2902_v20, %s2780_s15 }
 0x3aa   : > { %v634_v42 = vpop.xlane.xlu1 %633 }
 0x3ae   : > { %v628_v54 = vpop.xlane.xlu1 %627  ;;  %v637_v55 = vpop.xlane.xlu0 %636 }
 0x3af   : > { %2603 = vrcp.f32 %v628_v54 }
 0x3b2   : > { %v646_v56 = vpop.xlane.xlu1 %645  ;;  %v631_v57 = vpop.xlane.xlu0 %630 }
 0x3b3   : > { %2605 = vrcp.f32 %v631_v57 }
 0x3b4   : > { %2607 = vrcp.f32 %v637_v55 }
 0x3b5   : > { %2609 = vrcp.f32 %v634_v42 }
 0x3b6   : > { %v640_v41 = vpop.xlane.xlu1 %639  ;;  %v649_v58 = vpop.xlane.xlu0 %648 }
 0x3b7   : > { %2611 = vrcp.f32 %v640_v41 }
 0x3b9   : > { %v2604_v61 = vpop.eup %2603 }
 0x3ba   : > { %v675_v59 = vpop.permute.xlu1 %674  ;;  %v643_v60 = vpop.xlane.xlu0 %642  ;;  %v658_v1 = vmul.f32 %v2604_v61, %v2986_v6 }
 0x3bb   : > { %2613 = vrcp.f32 %v643_v60 }
 0x3bc   : > { %2615 = vrcp.f32 %v649_v58 }
 0x3bd   : > { %v2606_v62 = vpop.eup %2605  ;;  %2617 = vrcp.f32 %v646_v56 }
 0x3be   : > { %v677_v63 = vpop.permute.xlu1 %676  ;;  %v673_v0 = vpop.permute.xlu0 %672  ;;  %v659_v3 = vmul.f32 %v2606_v62, %v2994_v10 }
 0x3bf   : > { %2331 = vmatprep.subr.bf16.mxu0 %v673_v0  ;;  %v2608_v5 = vpop.eup %2607 }
 0x3c0   : > { %2332 = vmatpush3.bf16.msra.mxu0 %v673_v0  ;;  %v666_v4 = vpack.c.bf16 %v659_v3, %v658_v1  ;;  %v2610_v9 = vpop.eup %2609  ;;  %v661_v10 = vmul.f32 %v2608_v5, %v2988_v7 }
 0x3c1   : > { %2333 = vmatprep.subr.bf16.mxu0 %v675_v59  ;;  %v2612_v14 = vpop.eup %2611  ;;  %v660_v25 = vmul.f32 %v2610_v9, %v2982_v2 }
 0x3c2   : > { %2337 = vmatprep.mubr.msk.bf16.mxu0 %vm577_vm2, %v666_v4  ;;  %v1264_v8 = vpop.permute.xlu0 %1263  ;;  %v1266_v16 = vpop.permute.xlu1 %1265  ;;  %v662_v28 = vmul.f32 %v2612_v14, %v3000_v13 }
 0x3c3   : > { %v1284_v12 = vsel %vm487_vm1, %v1264_v8, 0  ;;  %2523 = vmatprep.subr.msk.bf16.mxu1 %vm487_vm1, %v1264_v8  ;;  %v667_v29 = vpack.c.bf16 %v661_v10, %v660_v25 }
 0x3c4   : > { %2334 = vmatpush3.bf16.msra.mxu0 %v675_v59  ;;  %2398 = vmatpush3.bf16.xpose.msra.mxu1 %v1284_v12 }
 0x3c5   : > { %v2614_v6 = vpop.eup %2613  ;;  %2335 = vmatprep.subr.bf16.mxu0 %v677_v63  ;;  %2524 = vmatprep.subr.msk.bf16.mxu1 %vm487_vm1, %v1266_v16 }
 0x3c6   : > { %v1268_v18 = vpop.permute.xlu0 %1267  ;;  %v663_v23 = vmul.f32 %v2614_v6, %v3010_v19  ;;  %v2616_v7 = vpop.eup %2615  ;;  %v1287_v19 = vsel %vm487_vm1, %v1266_v16, 0 }
 0x3c7   : > { %v2618_v46 = vpop.eup %2617  ;;  %v665_v2 = vmul.f32 %v2616_v7, %v3004_v15  ;;  %v1290_v31 = vsel %vm487_vm1, %v1268_v18, 0  ;;  %v1270_v48 = vpop.permute.xlu1 %1269 }
 0x3c8   : > { %2336 = vmatpush3.bf16.msra.mxu0 %v677_v63  ;;  %v668_v45 = vpack.c.bf16 %v663_v23, %v662_v28  ;;  %v664_v13 = vmul.f32 %v2618_v46, %v2996_v11  ;;  %v1293_v49 = vsel %vm487_vm1, %v1270_v48, 0 }
 0x3c9   : > { %2517 = vmatprep.subr.msk.bf16.mxu0 %vm776_vm3, %v763_v24 }
 0x3ca   : > { %v1256_v43 = vpop.permute.xlu0 %1255  ;;  %v669_v40 = vpack.c.bf16 %v665_v2, %v664_v13 }
 0x3cb   : > { %2338 = vmatmul.mubr.msk.bf16.vlgmr.msra.gmra.mrb[8].mxu0 %vm577_vm2, %v667_v29  ;;  %2405 = vmatprep.mubr.msk.bf16.mxu1 %vm487_vm1, %v1256_v43  ;;  %v1258_v39 = vpop.permute.xlu1 %1257 }
 0x3cc   : > { %2341 = vmatprep.mubr.msk.bf16.mxu0 %vm577_vm2, %v668_v45  ;;  %2400 = vmatpush3.bf16.xpose.msra.mxu1 %v1287_v19 }
 0x3cd   : > { %2525 = vmatprep.subr.msk.bf16.mxu1 %vm487_vm1, %v1268_v18  ;;  %2346 = vmatpush3.bf16.msra.mxu0 %v778_v35 }
 0x3ce   : > { %v1260_v51 = vpop.permute.xlu0 %1259 }
 0x3cf   : > { %v1262_v15 = vpop.permute.xlu1 %1261 }
 0x3d3   : > { %2342 = vmatmul.mubr.msk.bf16.gmra.mrb[12].mxu0 %vm577_vm2, %v669_v40 }
 0x3d4   : > { %2402 = vmatpush3.bf16.xpose.msra.mxu1 %v1290_v31 }
 0x3d5   : > { %2526 = vmatprep.subr.msk.bf16.mxu1 %vm487_vm1, %v1270_v48 }
 0x3dc   : > { %2404 = vmatpush3.bf16.xpose.msra.mxu1 %v1293_v49 }
 0x3e3   : > { %2406 = vmatmul.mubr.msk.bf16.vlgmr.msra.gmra.mrb[16].mxu1 %vm487_vm1, %v1258_v39 }
 0x3e4   : > { %2409 = vmatprep.mubr.msk.bf16.mxu1 %vm487_vm1, %v1260_v51 }
 0x3eb   : > { %2410 = vmatmul.mubr.msk.bf16.gmra.mrb[20].mxu1 %vm487_vm1, %v1262_v15 }
 0x3ff   : > { %v976_v11 = vpop.xlane.xlu1 %975  ;;  %v973_v52 = vpop.xlane.xlu0 %972 }
 0x400   : > { %v995_v53 = vsub.f32 %v3032_v27, %v973_v52  ;;  %v996_v56 = vsub.f32 %v3029_v26, %v976_v11 }
 0x402   : > { %v1003_v57 = vmul.f32 1.442695, %v995_v53  ;;  %v1005_v62 = vmul.f32 1.442695, %v996_v56 }
 0x403   : > { %v985_v42 = vpop.xlane.xlu1 %984  ;;  %v979_v54 = vpop.xlane.xlu0 %978 }
 0x404   : > { %v997_v55 = vsub.f32 %v3040_v44, %v979_v54  ;;  %v999_v63 = vsub.f32 %v3035_v30, %v985_v42 }
 0x406   : > { %v1007_v41 = vmul.f32 1.442695, %v997_v55  ;;  %v1011_v26 = vmul.f32 1.442695, %v999_v63  ;;  %v1247_v55 = vld [vmem:[#allocation2 + $0x80] sm:$0xff] }
 0x407   : > { %v991_v58 = vpop.xlane.xlu1 %990  ;;  %v982_v60 = vpop.xlane.xlu0 %981 }
 0x408   : > { %v1001_v59 = vsub.f32 %v3045_v32, %v991_v58  ;;  %2619 = vpow2.f32 %v1007_v41  ;;  %v998_v61 = vsub.f32 %v3050_v47, %v982_v60 }
 0x409   : > { %2621 = vpow2.f32 %v1003_v57 }
 0x40a   : > { %v1015_v27 = vmul.f32 1.442695, %v1001_v59  ;;  %v1009_v0 = vmul.f32 1.442695, %v998_v61  ;;  %v1249_v59 = vld [vmem:[#allocation2 + $0x90] sm:$0xff]  ;;  %v1248_v61 = vld [vmem:[#allocation2 + $0x88] sm:$0xff] }
 0x40b   : > { %v1064_v1 = vpop.permute.xlu1 %1063  ;;  %v988_v3 = vpop.xlane.xlu0 %987 }
 0x40c   : > { %2371 = vmatprep.subr.bf16.mxu0 %v1064_v1  ;;  %2623 = vpow2.f32 %v1009_v0  ;;  %v1000_v44 = vsub.f32 %v3057_v50, %v988_v3 }
 0x40d   : > { %2625 = vpow2.f32 %v1005_v62 }
 0x40e   : > { %2627 = vpow2.f32 %v1015_v27  ;;  %v1013_v47 = vmul.f32 1.442695, %v1000_v44 }
 0x40f   : > { %v994_v32 = vpop.xlane.xlu0 %993  ;;  %2629 = vpow2.f32 %v1011_v26 }
 0x410   : > { %v1002_v4 = vsub.f32 %v3062_v33, %v994_v32 }
 0x412   : > { %v3107_v5 = vpop.eup %2619  ;;  %v1017_v8 = vmul.f32 1.442695, %v1002_v4 }
 0x413   : > { %v1025_v30 = vsel %vm577_vm2, %v3107_v5, 0.0  ;;  %v3111_v9 = vpop.eup %2621 }
 0x414   : > { %2631 = vpow2.f32 %v1017_v8  ;;  %1026 = vadd.xlane.f32.xlu1 %v1025_v30  ;;  %v1019_v50 = vsel %vm577_vm2, %v3111_v9, 0.0  ;;  %v1250_v8 = vld [vmem:[#allocation2 + $0x98] sm:$0xff] }
 0x415   : > { %2633 = vpow2.f32 %v1013_v47 }
 0x416   : > { %v3113_v12 = vpop.eup %2623 }
 0x417   : > { %v3115_v14 = vpop.eup %2625  ;;  %v1028_v33 = vsel %vm577_vm2, %v3113_v12, 0.0 }
 0x418   : > { %v3121_v16 = vpop.eup %2627  ;;  %1020 = vadd.xlane.f32.xlu1 %v1019_v50  ;;  %1029 = vadd.xlane.f32.xlu0 %v1028_v33  ;;  %v1022_v10 = vsel %vm577_vm2, %v3115_v14, 0.0  ;;  %v1251_v33 = vld [vmem:[#allocation2 + $0xa0] sm:$0xff] }
 0x419   : > { %v1037_v6 = vsel %vm577_vm2, %v3121_v16, 0.0  ;;  %v3127_v18 = vpop.eup %2629 }
 0x41a   : > { %v1031_v24 = vsel %vm577_vm2, %v3127_v18, 0.0 }
 0x41c   : > { %1038 = vadd.xlane.f32.xlu1 %v1037_v6  ;;  %1023 = vadd.xlane.f32.xlu0 %v1022_v10 }
 0x41e   : > { %v3129_v23 = vpop.eup %2631 }
 0x41f   : > { %v1040_v25 = vsel %vm577_vm2, %v3129_v23, 0.0  ;;  %v3135_v28 = vpop.eup %2633 }
 0x420   : > { %1032 = vadd.xlane.f32.xlu1 %v1031_v24  ;;  %1041 = vadd.xlane.f32.xlu0 %v1040_v25  ;;  %v1034_v29 = vsel %vm577_vm2, %v3135_v28, 0.0 }
 0x424   : > { %1035 = vadd.xlane.f32.xlu0 %v1034_v29 }
 0x431   : > { %1067 = vrot.lane.b32.xlu1 %v2914_v36, %s2780_s15 }
 0x435   : > { %1069 = vrot.lane.b32.xlu1 %v2912_v34, %s2780_s15 }
 0x439   : > { %1654 = vrot.lane.b32.xlu1 %v2900_v17, %s2781_s18 }
 0x43a   : > { %1065 = vrot.lane.b32.xlu0 %v2900_v17, %s2780_s15 }
 0x43d   : > { %1658 = vrot.lane.b32.xlu1 %v2912_v34, %s2781_s18 }
 0x43e   : > { %1652 = vrot.lane.b32.xlu0 %v2902_v20, %s2781_s18 }
 0x441   : > { %1646 = vrot.lane.b32.xlu1 %v2904_v21, %s2782_s19 }
 0x442   : > { %1656 = vrot.lane.b32.xlu0 %v2914_v36, %s2781_s18 }
 0x445   : > { %1650 = vrot.lane.b32.xlu1 %v2916_v37, %s2782_s19 }
 0x446   : > { %1644 = vrot.lane.b32.xlu0 %v2906_v22, %s2782_s19 }
 0x44a   : > { %1648 = vrot.lane.b32.xlu0 %v2918_v38, %s2782_s19 }
 0x49e   : > { %v2339_v7 = vpop.f32.mrb[8].mxu0 }
 0x49f   : > { %v728_v43 = vpop.f32.mrb[9].mxu0 }
 0x4a0   : > { %v2340_v45 = vpop.f32.mrb[10].mxu0 }
 0x4a1   : > { %v760_v35 = vpack.c.bf16 %v2340_v45, %v2339_v7  ;;  %v731_v19 = vpop.f32.mrb[11].mxu0  ;;  %v1027_v46 = vpop.xlane.xlu1 %1026 }
 0x4a2   : > { %v759_v2 = vpack.c.bf16 %v731_v19, %v728_v43 }
 0x4a4   : > { %2347 = vmatprep.mubr.msk.bf16.mxu0 %vm487_vm1, %v759_v2 }
 0x4a5   : > { %2348 = vmatmul.mubr.msk.bf16.vlgmr.msra.gmra.mrb[16].mxu0 %vm487_vm1, %v760_v35  ;;  %v1021_v21 = vpop.xlane.xlu1 %1020  ;;  %v1030_v13 = vpop.xlane.xlu0 %1029 }
 0x4a6   : > { %2372 = vmatpush3.bf16.msra.mxu0 %v1064_v1  ;;  %v2343_v40 = vpop.f32.mrb[12].mxu0  ;;  %2635 = vrcp.f32 %v1021_v21 }
 0x4a7   : > { %v744_v37 = vpop.f32.mrb[13].mxu0 }
 0x4a8   : > { %v2344_v31 = vpop.f32.mrb[14].mxu0 }
 0x4a9   : > { %v762_v22 = vpack.c.bf16 %v2344_v31, %v2343_v40  ;;  %v747_v38 = vpop.f32.mrb[15].mxu0  ;;  %v1039_v48 = vpop.xlane.xlu1 %1038 }
 0x4aa   : > { %v761_v49 = vpack.c.bf16 %v747_v38, %v744_v37  ;;  %v1024_v39 = vpop.xlane.xlu0 %1023 }
 0x4ab   : > { %2637 = vrcp.f32 %v1024_v39 }
 0x4ac   : > { %2351 = vmatprep.mubr.msk.bf16.mxu0 %vm487_vm1, %v761_v49  ;;  %2639 = vrcp.f32 %v1030_v13  ;;  %v1254_v49 = vld [vmem:[#allocation2 + $0xb8] sm:$0xff] }
 0x4ad   : > { %2352 = vmatmul.mubr.msk.bf16.gmra.mrb[20].mxu0 %vm487_vm1, %v762_v22  ;;  %v1033_v51 = vpop.xlane.xlu1 %1032  ;;  %2641 = vrcp.f32 %v1027_v46  ;;  %v1252_v46 = vld [vmem:[#allocation2 + $0xa8] sm:$0xff] }
 0x4ae   : > { %v1042_v15 = vpop.xlane.xlu0 %1041 }
 0x4b0   : > { %v2636_v53 = vpop.eup %2635 }
 0x4b1   : > { %v1068_v11 = vpop.permute.xlu1 %1067  ;;  %v1051_v41 = vmul.f32 %v2636_v53, %v3111_v9 }
 0x4b2   : > { %v1036_v52 = vpop.xlane.xlu0 %1035 }
 0x4b3   : > { %2643 = vrcp.f32 %v1036_v52 }
 0x4b4   : > { %2645 = vrcp.f32 %v1033_v51 }
 0x4b5   : > { %v2638_v42 = vpop.eup %2637  ;;  %v1070_v54 = vpop.permute.xlu1 %1069  ;;  %2647 = vrcp.f32 %v1042_v15 }
 0x4b6   : > { %v1066_v56 = vpop.permute.xlu0 %1065  ;;  %v2407_v57 = vpop.f32.mrb[16].mxu1  ;;  %v1052_v58 = vmul.f32 %v2638_v42, %v3115_v14  ;;  %2649 = vrcp.f32 %v1039_v48 }
 0x4b7   : > { %2373 = vmatprep.subr.bf16.mxu0 %v1066_v56  ;;  %v1329_v60 = vpop.f32.mrb[17].mxu1  ;;  %v2640_v1 = vpop.eup %2639  ;;  %v3161_v3 = vadd.f32 %v2407_v57, %v1249_v59 }
 0x4b8   : > { %2374 = vmatpush3.bf16.msra.mxu0 %v1066_v56  ;;  %v3159_v62 = vadd.f32 %v1329_v60, %v1247_v55  ;;  %v2408_v63 = vpop.f32.mrb[18].mxu1  ;;  %v1059_v27 = vpack.c.bf16 %v1052_v58, %v1051_v41  ;;  %v2642_v47 = vpop.eup %2641  ;;  %v1054_v50 = vmul.f32 %v2640_v1, %v3113_v12  ;;  %v1253_v12 = vld [vmem:[#allocation2 + $0xb0] sm:$0xff] }
 0x4b9   : > { %2375 = vmatprep.subr.bf16.mxu0 %v1068_v11  ;;  %v1332_v0 = vpop.f32.mrb[19].mxu1  ;;  %v1655_v30 = vpop.permute.xlu1 %1654  ;;  %v1366_v25 = vsel %vm577_vm2, %v3161_v3, -inf  ;;  %v1053_v29 = vmul.f32 %v2642_v47, %v3107_v5  ;;  %v3177_v7 = vadd.f32 %v2408_v63, %v1250_v8 }
 0x4ba   : > { %v3163_v26 = vadd.f32 %v1332_v0, %v1248_v61  ;;  %2379 = vmatprep.mubr.msk.bf16.mxu0 %vm577_vm2, %v1059_v27  ;;  %v1653_v44 = vpop.permute.xlu0 %1652  ;;  %v1360_v32 = vsel %vm577_vm2, %v3159_v62, -inf }
 0x4bb   : > { %v1673_v4 = vsel %vm487_vm1, %v1653_v44, 0  ;;  %2528 = vmatprep.subr.msk.bf16.mxu1 %vm487_vm1, %v1653_v44  ;;  %1361 = vmax.xlane.f32.xlu0 %v1360_v32  ;;  %v1060_v2 = vpack.c.bf16 %v1054_v50, %v1053_v29 }
 0x4bc   : > { %2376 = vmatpush3.bf16.msra.mxu0 %v1068_v11  ;;  %2440 = vmatpush3.bf16.xpose.msra.mxu1 %v1673_v4  ;;  %v1363_v9 = vsel %vm577_vm2, %v3163_v26, -inf }
 0x4bd   : > { %v2644_v14 = vpop.eup %2643  ;;  %2377 = vmatprep.subr.bf16.mxu0 %v1070_v54  ;;  %2529 = vmatprep.subr.msk.bf16.mxu1 %vm487_vm1, %v1655_v30 }
 0x4be   : > { %v2646_v6 = vpop.eup %2645  ;;  %1364 = vmax.xlane.f32.xlu1 %v1363_v9  ;;  %v1657_v10 = vpop.permute.xlu0 %1656  ;;  %v1056_v45 = vmul.f32 %v2644_v14, %v3135_v28  ;;  %v1369_v28 = vsel %vm577_vm2, %v3177_v7, -inf }
 0x4bf   : > { %v2411_v24 = vpop.f32.mrb[20].mxu1  ;;  %1367 = vmax.xlane.f32.xlu0 %v1366_v25  ;;  %v1055_v13 = vmul.f32 %v2646_v6, %v3127_v18  ;;  %v2648_v40 = vpop.eup %2647  ;;  %v1676_v18 = vsel %vm487_vm1, %v1655_v30, 0 }
 0x4c0   : > { %v1345_v43 = vpop.f32.mrb[21].mxu1  ;;  %2378 = vmatpush3.bf16.msra.mxu0 %v1070_v54  ;;  %v3185_v31 = vadd.f32 %v2411_v24, %v1253_v12  ;;  %v2650_v48 = vpop.eup %2649  ;;  %v1058_v39 = vmul.f32 %v2648_v40, %v3129_v23  ;;  %v1679_v23 = vsel %vm487_vm1, %v1657_v10, 0 }
 0x4c1   : > { %v3180_v35 = vadd.f32 %v1345_v43, %v1251_v33  ;;  %v2412_v19 = vpop.f32.mrb[22].mxu1  ;;  %v1061_v38 = vpack.c.bf16 %v1056_v45, %v1055_v13  ;;  %v1057_v52 = vmul.f32 %v2650_v48, %v3121_v16  ;;  %v1659_v54 = vpop.permute.xlu1 %1658  ;;  %v2176_v16 = vld [vmem:[%s3404_s4 + $0x4] sm:$0xf] }
 0x4c2   : > { %v1348_v21 = vpop.f32.mrb[23].mxu1  ;;  %v1645_v37 = vpop.permute.xlu0 %1644  ;;  %v1357_v51 = vadd.f32 %v2412_v19, %v1254_v49  ;;  %v1378_v15 = vsel %vm577_vm2, %v3185_v31, -inf  ;;  %v1682_v55 = vsel %vm487_vm1, %v1659_v54, 0  ;;  %2522 = vmatprep.subr.msk.bf16.mxu0 %vm776_vm3, %v2176_v16  ;;  %v1171_v56 = vsel %vm776_vm3, %v2176_v16, 0  ;;  %v1638_v16 = vld [vmem:[#allocation2 + $0xd0] sm:$0xff] }
 0x4c3   : > { %v1372_v5 = vsel %vm577_vm2, %v3180_v35, -inf  ;;  %v3187_v22 = vadd.f32 %v1348_v21, %v1252_v46  ;;  %2380 = vmatmul.mubr.msk.bf16.vlgmr.msra.gmra.mrb[24].mxu0 %vm577_vm2, %v1060_v2  ;;  %2447 = vmatprep.mubr.msk.bf16.mxu1 %vm487_vm1, %v1645_v37  ;;  %v1062_v53 = vpack.c.bf16 %v1058_v39, %v1057_v52 }
 0x4c4   : > { %1373 = vmax.xlane.f32.xlu1 %v1372_v5  ;;  %1370 = vmax.xlane.f32.xlu0 %v1369_v28  ;;  %v1381_v42 = vsel %vm577_vm2, %v1357_v51, -inf }
 0x4c5   : > { %2383 = vmatprep.mubr.msk.bf16.mxu0 %vm577_vm2, %v1061_v38  ;;  %2442 = vmatpush3.bf16.xpose.msra.mxu1 %v1676_v18  ;;  %v1375_v11 = vsel %vm577_vm2, %v3187_v22, -inf  ;;  %v1647_v57 = vpop.permute.xlu1 %1646 }
 0x4c6   : > { %2530 = vmatprep.subr.msk.bf16.mxu1 %vm487_vm1, %v1657_v10  ;;  %2388 = vmatpush3.bf16.msra.mxu0 %v1171_v56  ;;  %v1649_v41 = vpop.permute.xlu0 %1648 }
 0x4c8   : > { %1379 = vmax.xlane.f32.xlu1 %v1378_v15  ;;  %1376 = vmax.xlane.f32.xlu0 %v1375_v11 }
 0x4c9   : > { %v1651_v58 = vpop.permute.xlu1 %1650 }
 0x4cb   : > { %2384 = vmatmul.mubr.msk.bf16.gmra.mrb[28].mxu0 %vm577_vm2, %v1062_v53 }
 0x4cc   : > { %1382 = vmax.xlane.f32.xlu0 %v1381_v42 }
 0x4cd   : > { %2444 = vmatpush3.bf16.xpose.msra.mxu1 %v1679_v23 }
 0x4ce   : > { %2531 = vmatprep.subr.msk.bf16.mxu1 %vm487_vm1, %v1659_v54  ;;  %v1636_v54 = vld [vmem:[#allocation2 + $0xc0] sm:$0xff] }
 0x4d5   : > { %2446 = vmatpush3.bf16.xpose.msra.mxu1 %v1682_v55 }
 0x4d9   : > { %1452 = vrot.lane.b32.xlu1 %v2902_v20, %s2783_s28 }
 0x4dc   : > { %2448 = vmatmul.mubr.msk.bf16.vlgmr.msra.gmra.mrb[24].mxu1 %vm487_vm1, %v1647_v57  ;;  %v1637_v57 = vld [vmem:[#allocation2 + $0xc8] sm:$0xff] }
 0x4dd   : > { %2451 = vmatprep.mubr.msk.bf16.mxu1 %vm487_vm1, %v1649_v41 }
 0x4e4   : > { %2452 = vmatmul.mubr.msk.bf16.gmra.mrb[28].mxu1 %vm487_vm1, %v1651_v58 }
 0x548   : > { %v1362_v59 = vpop.xlane.xlu0 %1361 }
 0x549   : > { %v1384_v60 = vsub.f32 %v3159_v62, %v1362_v59 }
 0x54b   : > { %v1365_v63 = vpop.xlane.xlu1 %1364  ;;  %v1392_v0 = vmul.f32 1.442695, %v1384_v60 }
 0x54c   : > { %v1368_v61 = vpop.xlane.xlu0 %1367  ;;  %v1385_v44 = vsub.f32 %v3163_v26, %v1365_v63 }
 0x54d   : > { %v1386_v27 = vsub.f32 %v3161_v3, %v1368_v61 }
 0x54e   : > { %v1394_v9 = vmul.f32 1.442695, %v1385_v44 }
 0x54f   : > { %v1396_v1 = vmul.f32 1.442695, %v1386_v27  ;;  %v1639_v27 = vld [vmem:[#allocation2 + $0xd8] sm:$0xff] }
 0x551   : > { %2651 = vpow2.f32 %v1396_v1  ;;  %v1374_v32 = vpop.xlane.xlu1 %1373  ;;  %v1371_v4 = vpop.xlane.xlu0 %1370  ;;  %v1640_v1 = vld [vmem:[#allocation2 + $0xe0] sm:$0xff] }
 0x552   : > { %v1387_v47 = vsub.f32 %v3177_v7, %v1371_v4  ;;  %2653 = vpow2.f32 %v1392_v0  ;;  %v1388_v8 = vsub.f32 %v3180_v35, %v1374_v32 }
 0x554   : > { %v1398_v30 = vmul.f32 1.442695, %v1387_v47  ;;  %v1400_v3 = vmul.f32 1.442695, %v1388_v8  ;;  %v1642_v47 = vld [vmem:[#allocation2 + $0xf0] sm:$0xff] }
 0x555   : > { %v1380_v14 = vpop.xlane.xlu1 %1379  ;;  %v1377_v62 = vpop.xlane.xlu0 %1376 }
 0x556   : > { %v1390_v50 = vsub.f32 %v3185_v31, %v1380_v14  ;;  %2655 = vpow2.f32 %v1398_v30  ;;  %v1389_v26 = vsub.f32 %v3187_v22, %v1377_v62  ;;  %v1641_v30 = vld [vmem:[#allocation2 + $0xe8] sm:$0xff] }
 0x557   : > { %2657 = vpow2.f32 %v1394_v9 }
 0x558   : > { %v1404_v33 = vmul.f32 1.442695, %v1390_v50  ;;  %v1402_v45 = vmul.f32 1.442695, %v1389_v26 }
 0x559   : > { %v1453_v6 = vpop.permute.xlu1 %1452  ;;  %v1383_v10 = vpop.xlane.xlu0 %1382 }
 0x55a   : > { %2659 = vpow2.f32 %v1404_v33  ;;  %v1391_v24 = vsub.f32 %v1357_v51, %v1383_v10  ;;  %2413 = vmatprep.subr.bf16.mxu0 %v1453_v6 }
 0x55b   : > { %v3224_v25 = vpop.eup %2651  ;;  %2661 = vpow2.f32 %v1400_v3 }
 0x55c   : > { %v1406_v29 = vmul.f32 1.442695, %v1391_v24  ;;  %v1414_v7 = vsel %vm577_vm2, %v3224_v25, 0.0  ;;  %v3228_v43 = vpop.eup %2653 }
 0x55d   : > { %1415 = vadd.xlane.f32.xlu1 %v1414_v7  ;;  %v1408_v12 = vsel %vm577_vm2, %v3228_v43, 0.0 }
 0x55e   : > { %2663 = vpow2.f32 %v1406_v29 }
 0x55f   : > { %2665 = vpow2.f32 %v1402_v45 }
 0x560   : > { %v3232_v35 = vpop.eup %2655 }
 0x561   : > { %1409 = vadd.xlane.f32.xlu1 %v1408_v12  ;;  %v1417_v19 = vsel %vm577_vm2, %v3232_v35, 0.0  ;;  %v3236_v46 = vpop.eup %2657 }
 0x562   : > { %1418 = vadd.xlane.f32.xlu0 %v1417_v19  ;;  %v1411_v40 = vsel %vm577_vm2, %v3236_v46, 0.0 }
 0x564   : > { %v3238_v2 = vpop.eup %2659 }
 0x565   : > { %v1426_v21 = vsel %vm577_vm2, %v3238_v2, 0.0  ;;  %v3242_v13 = vpop.eup %2661 }
 0x566   : > { %1427 = vadd.xlane.f32.xlu1 %v1426_v21  ;;  %1412 = vadd.xlane.f32.xlu0 %v1411_v40  ;;  %v1420_v5 = vsel %vm577_vm2, %v3242_v13, 0.0 }
 0x568   : > { %v3246_v37 = vpop.eup %2663 }
 0x569   : > { %v1429_v31 = vsel %vm577_vm2, %v3246_v37, 0.0  ;;  %v3252_v22 = vpop.eup %2665 }
 0x56a   : > { %1421 = vadd.xlane.f32.xlu1 %v1420_v5  ;;  %1430 = vadd.xlane.f32.xlu0 %v1429_v31  ;;  %v1423_v28 = vsel %vm577_vm2, %v3252_v22, 0.0 }
 0x56e   : > { %1424 = vadd.xlane.f32.xlu0 %v1423_v28 }
 0x57b   : > { %1456 = vrot.lane.b32.xlu1 %v2914_v36, %s2783_s28 }
 0x57f   : > { %1458 = vrot.lane.b32.xlu1 %v2912_v34, %s2783_s28 }
 0x584   : > { %1454 = vrot.lane.b32.xlu0 %v2900_v17, %s2783_s28 }
 0x596   : > { %v2381_v38 = vpop.f32.mrb[24].mxu0 }
 0x597   : > { %v1121_v48 = vpop.f32.mrb[25].mxu0 }
 0x598   : > { %v2382_v18 = vpop.f32.mrb[26].mxu0 }
 0x599   : > { %v1153_v49 = vpack.c.bf16 %v2382_v18, %v2381_v38  ;;  %v1124_v39 = vpop.f32.mrb[27].mxu0 }
 0x59a   : > { %v1152_v51 = vpack.c.bf16 %v1124_v39, %v1121_v48 }
 0x59c   : > { %2389 = vmatprep.mubr.msk.bf16.mxu0 %vm487_vm1, %v1152_v51 }
 0x59d   : > { %2390 = vmatmul.mubr.msk.bf16.vlgmr.msra.gmra.mrb[16].mxu0 %vm487_vm1, %v1153_v49 }
 0x59e   : > { %2414 = vmatpush3.bf16.msra.mxu0 %v1453_v6  ;;  %v2385_v15 = vpop.f32.mrb[28].mxu0  ;;  %v1643_v6 = vld [vmem:[#allocation2 + $0xf8] sm:$0xff] }
 0x59f   : > { %v1137_v11 = vpop.f32.mrb[29].mxu0 }
 0x5a0   : > { %v2386_v52 = vpop.f32.mrb[30].mxu0 }
 0x5a1   : > { %v1155_v53 = vpack.c.bf16 %v2386_v52, %v2385_v15  ;;  %v1140_v42 = vpop.f32.mrb[31].mxu0 }
 0x5a2   : > { %v1154_v23 = vpack.c.bf16 %v1140_v42, %v1137_v11 }
 0x5a4   : > { %2393 = vmatprep.mubr.msk.bf16.mxu0 %vm487_vm1, %v1154_v23 }
 0x5a5   : > { %2394 = vmatmul.mubr.msk.bf16.gmra.mrb[20].mxu0 %vm487_vm1, %v1155_v53 }
 0x5af   : > { %v2449_v55 = vpop.f32.mrb[24].mxu1 }
 0x5b0   : > { %v1718_v56 = vpop.f32.mrb[25].mxu1  ;;  %v3268_v60 = vadd.f32 %v2449_v55, %v1638_v16 }
 0x5b1   : > { %v3266_v41 = vadd.f32 %v1718_v56, %v1636_v54  ;;  %v2450_v58 = vpop.f32.mrb[26].mxu1 }
 0x5b2   : > { %v1721_v59 = vpop.f32.mrb[27].mxu1  ;;  %v3276_v44 = vadd.f32 %v2450_v58, %v1639_v27  ;;  %v1755_v4 = vsel %vm577_vm2, %v3268_v60, -inf }
 0x5b3   : > { %v3270_v61 = vadd.f32 %v1721_v59, %v1637_v57  ;;  %v1749_v63 = vsel %vm577_vm2, %v3266_v41, -inf }
 0x5b4   : > { %1750 = vmax.xlane.f32.xlu0 %v1749_v63  ;;  %v1758_v26 = vsel %vm577_vm2, %v3276_v44, -inf }
 0x5b5   : > { %v1752_v0 = vsel %vm577_vm2, %v3270_v61, -inf }
 0x5b6   : > { %1753 = vmax.xlane.f32.xlu1 %v1752_v0 }
 0x5b7   : > { %v2453_v32 = vpop.f32.mrb[28].mxu1 }
 0x5b8   : > { %v1734_v8 = vpop.f32.mrb[29].mxu1  ;;  %1756 = vmax.xlane.f32.xlu0 %v1755_v4  ;;  %v3282_v50 = vadd.f32 %v2453_v32, %v1642_v47 }
 0x5b9   : > { %v3280_v9 = vadd.f32 %v1734_v8, %v1640_v1  ;;  %v2454_v14 = vpop.f32.mrb[30].mxu1 }
 0x5ba   : > { %v1737_v62 = vpop.f32.mrb[31].mxu1  ;;  %v3290_v10 = vadd.f32 %v2454_v14, %v1643_v6  ;;  %v1767_v24 = vsel %vm577_vm2, %v3282_v50, -inf }
 0x5bb   : > { %v3284_v3 = vadd.f32 %v1737_v62, %v1641_v30  ;;  %v1761_v33 = vsel %vm577_vm2, %v3280_v9, -inf }
 0x5bc   : > { %1762 = vmax.xlane.f32.xlu1 %v1761_v33  ;;  %1759 = vmax.xlane.f32.xlu0 %v1758_v26  ;;  %v1770_v7 = vsel %vm577_vm2, %v3290_v10, -inf }
 0x5bd   : > { %v1764_v29 = vsel %vm577_vm2, %v3284_v3, -inf }
 0x5c0   : > { %1768 = vmax.xlane.f32.xlu1 %v1767_v24  ;;  %1765 = vmax.xlane.f32.xlu0 %v1764_v29 }
 0x5c4   : > { %1771 = vmax.xlane.f32.xlu0 %v1770_v7 }
 0x5d1   : > { %1841 = vrot.lane.b32.xlu1 %v2902_v20, %s2784_s29 }
 0x5ea   : > { %v1416_v45 = vpop.xlane.xlu1 %1415 }
 0x5ee   : > { %v1410_v12 = vpop.xlane.xlu1 %1409 }
 0x5ef   : > { %v1419_v19 = vpop.xlane.xlu0 %1418  ;;  %2667 = vrcp.f32 %v1410_v12 }
 0x5f3   : > { %v1428_v21 = vpop.xlane.xlu1 %1427  ;;  %v1413_v40 = vpop.xlane.xlu0 %1412 }
 0x5f4   : > { %2669 = vrcp.f32 %v1413_v40 }
 0x5f5   : > { %2671 = vrcp.f32 %v1419_v19 }
 0x5f6   : > { %2673 = vrcp.f32 %v1416_v45 }
 0x5f7   : > { %v1431_v5 = vpop.xlane.xlu0 %1430  ;;  %v1422_v31 = vpop.xlane.xlu1 %1421 }
 0x5f8   : > { %2675 = vrcp.f32 %v1422_v31 }
 0x5f9   : > { %v2668_v38 = vpop.eup %2667 }
 0x5fa   : > { %v1440_v20 = vmul.f32 %v2668_v38, %v3228_v43 }
 0x5fb   : > { %v1425_v28 = vpop.xlane.xlu0 %1424  ;;  %v1457_v18 = vpop.permute.xlu1 %1456 }
 0x5fc   : > { %2677 = vrcp.f32 %v1425_v28 }
 0x5fd   : > { %2679 = vrcp.f32 %v1431_v5 }
 0x5fe   : > { %v2670_v48 = vpop.eup %2669  ;;  %2681 = vrcp.f32 %v1428_v21 }
 0x5ff   : > { %v1455_v49 = vpop.permute.xlu0 %1454  ;;  %v1441_v39 = vmul.f32 %v2670_v48, %v3236_v46  ;;  %v2672_v15 = vpop.eup %2671  ;;  %v2189_v46 = vld [vmem:[%s3404_s4 + $0x8] sm:$0xf] }
 0x600   : > { %2415 = vmatprep.subr.bf16.mxu0 %v1455_v49  ;;  %v2674_v11 = vpop.eup %2673  ;;  %v1459_v53 = vpop.permute.xlu1 %1458  ;;  %v1443_v23 = vmul.f32 %v2672_v15, %v3232_v35  ;;  %v1560_v56 = vsel %vm776_vm3, %v2189_v46, 0 }
 0x601   : > { %2416 = vmatpush3.bf16.msra.mxu0 %v1455_v49  ;;  %v1448_v51 = vpack.c.bf16 %v1441_v39, %v1440_v20  ;;  %v1442_v54 = vmul.f32 %v2674_v11, %v3224_v25 }
 0x602   : > { %2417 = vmatprep.subr.bf16.mxu0 %v1457_v18  ;;  %v2676_v52 = vpop.eup %2675 }
 0x603   : > { %2421 = vmatprep.mubr.msk.bf16.mxu0 %vm577_vm2, %v1448_v51  ;;  %v1444_v55 = vmul.f32 %v2676_v52, %v3242_v13  ;;  %v1449_v16 = vpack.c.bf16 %v1443_v23, %v1442_v54 }
 0x605   : > { %2418 = vmatpush3.bf16.msra.mxu0 %v1457_v18 }
 0x606   : > { %v2678_v42 = vpop.eup %2677  ;;  %2419 = vmatprep.subr.bf16.mxu0 %v1459_v53 }
 0x607   : > { %v1445_v43 = vmul.f32 %v2678_v42, %v3252_v22  ;;  %v2680_v57 = vpop.eup %2679 }
 0x608   : > { %v2682_v35 = vpop.eup %2681  ;;  %v1447_v22 = vmul.f32 %v2680_v57, %v3246_v37 }
 0x609   : > { %2420 = vmatpush3.bf16.msra.mxu0 %v1459_v53  ;;  %v1450_v58 = vpack.c.bf16 %v1445_v43, %v1444_v55  ;;  %v1446_v25 = vmul.f32 %v2682_v35, %v3238_v2 }
 0x60a   : > { %2527 = vmatprep.subr.msk.bf16.mxu0 %vm776_vm3, %v2189_v46 }
 0x60b   : > { %v1451_v59 = vpack.c.bf16 %v1447_v22, %v1446_v25 }
 0x60c   : > { %2422 = vmatmul.mubr.msk.bf16.vlgmr.msra.gmra.mrb[32].mxu0 %vm577_vm2, %v1449_v16 }
 0x60d   : > { %2425 = vmatprep.mubr.msk.bf16.mxu0 %vm577_vm2, %v1450_v58  ;;  %2430 = vmatpush3.bf16.msra.mxu0 %v1560_v56 }
 0x614   : > { %2426 = vmatmul.mubr.msk.bf16.gmra.mrb[36].mxu0 %vm577_vm2, %v1451_v59 }
 0x641   : > { %v1751_v13 = vpop.xlane.xlu0 %1750 }
 0x642   : > { %v1773_v63 = vsub.f32 %v3266_v41, %v1751_v13 }
 0x643   : > { %v1754_v27 = vpop.xlane.xlu1 %1753 }
 0x644   : > { %v1781_v32 = vmul.f32 1.442695, %v1773_v63  ;;  %v1774_v47 = vsub.f32 %v3270_v61, %v1754_v27 }
 0x645   : > { %v1757_v0 = vpop.xlane.xlu0 %1756 }
 0x646   : > { %v1775_v1 = vsub.f32 %v3268_v60, %v1757_v0  ;;  %v1783_v62 = vmul.f32 1.442695, %v1774_v47 }
 0x648   : > { %v1785_v4 = vmul.f32 1.442695, %v1775_v1 }
 0x649   : > { %v1763_v8 = vpop.xlane.xlu1 %1762  ;;  %v1760_v30 = vpop.xlane.xlu0 %1759 }
 0x64a   : > { %2683 = vpow2.f32 %v1785_v4  ;;  %v1776_v37 = vsub.f32 %v3276_v44, %v1760_v30  ;;  %v1777_v2 = vsub.f32 %v3280_v9, %v1763_v8 }
 0x64b   : > { %2685 = vpow2.f32 %v1781_v32 }
 0x64c   : > { %v1787_v14 = vmul.f32 1.442695, %v1776_v37  ;;  %v1789_v60 = vmul.f32 1.442695, %v1777_v2  ;;  %v2202_v2 = vld [vmem:[%s3404_s4 + $0xc] sm:$0xf] }
 0x64d   : > { %v1769_v33 = vpop.xlane.xlu1 %1768  ;;  %v1766_v41 = vpop.xlane.xlu0 %1765 }
 0x64e   : > { %v1779_v26 = vsub.f32 %v3282_v50, %v1769_v33  ;;  %2687 = vpow2.f32 %v1787_v14  ;;  %v1778_v61 = vsub.f32 %v3284_v3, %v1766_v41  ;;  %v1949_v41 = vsel %vm776_vm3, %v2202_v2, 0 }
 0x64f   : > { %2689 = vpow2.f32 %v1783_v62 }
 0x650   : > { %v1793_v6 = vmul.f32 1.442695, %v1779_v26  ;;  %v1791_v45 = vmul.f32 1.442695, %v1778_v61 }
 0x651   : > { %v1842_v24 = vpop.permute.xlu1 %1841  ;;  %v1772_v29 = vpop.xlane.xlu0 %1771 }
 0x652   : > { %2691 = vpow2.f32 %v1793_v6  ;;  %v1780_v44 = vsub.f32 %v3290_v10, %v1772_v29  ;;  %2455 = vmatprep.subr.bf16.mxu0 %v1842_v24 }
 0x653   : > { %2693 = vpow2.f32 %v1789_v60 }
 0x654   : > { %v3325_v7 = vpop.eup %2683  ;;  %v1795_v9 = vmul.f32 1.442695, %v1780_v44 }
 0x655   : > { %v1803_v50 = vsel %vm577_vm2, %v3325_v7, 0.0  ;;  %v2686_v12 = vpop.eup %2685 }
 0x656   : > { %2695 = vpow2.f32 %v1795_v9  ;;  %1804 = vadd.xlane.f32.xlu1 %v1803_v50  ;;  %v1797_v3 = vsel %vm577_vm2, %v2686_v12, 0.0 }
 0x657   : > { %2697 = vpow2.f32 %v1791_v45 }
 0x658   : > { %v3329_v19 = vpop.eup %2687 }
 0x659   : > { %v1806_v10 = vsel %vm577_vm2, %v3329_v19, 0.0  ;;  %v2690_v21 = vpop.eup %2689 }
 0x65a   : > { %1798 = vadd.xlane.f32.xlu1 %v1797_v3  ;;  %1807 = vadd.xlane.f32.xlu0 %v1806_v10  ;;  %v1800_v28 = vsel %vm577_vm2, %v2690_v21, 0.0 }
 0x65c   : > { %v3334_v40 = vpop.eup %2691 }
 0x65d   : > { %v1815_v5 = vsel %vm577_vm2, %v3334_v40, 0.0  ;;  %v3338_v31 = vpop.eup %2693 }
 0x65e   : > { %1816 = vadd.xlane.f32.xlu1 %v1815_v5  ;;  %1801 = vadd.xlane.f32.xlu0 %v1800_v28  ;;  %v1809_v48 = vsel %vm577_vm2, %v3338_v31, 0.0 }
 0x660   : > { %v3341_v38 = vpop.eup %2695 }
 0x661   : > { %v1818_v18 = vsel %vm577_vm2, %v3341_v38, 0.0  ;;  %v2698_v49 = vpop.eup %2697 }
 0x662   : > { %1810 = vadd.xlane.f32.xlu1 %v1809_v48  ;;  %1819 = vadd.xlane.f32.xlu0 %v1818_v18  ;;  %v1812_v20 = vsel %vm577_vm2, %v2698_v49, 0.0 }
 0x666   : > { %1813 = vadd.xlane.f32.xlu0 %v1812_v20 }
 0x673   : > { %1845 = vrot.lane.b32.xlu1 %v2914_v36, %s2784_s29 }
 0x677   : > { %1847 = vrot.lane.b32.xlu1 %v2912_v34, %s2784_s29 }
 0x67c   : > { %1843 = vrot.lane.b32.xlu0 %v2900_v17, %s2784_s29 }
 0x6df   : > { %v2423_v39 = vpop.f32.mrb[32].mxu0 }
 0x6e0   : > { %v1510_v51 = vpop.f32.mrb[33].mxu0 }
 0x6e1   : > { %v2424_v15 = vpop.f32.mrb[34].mxu0 }
 0x6e2   : > { %v1542_v11 = vpack.c.bf16 %v2424_v15, %v2423_v39  ;;  %v1513_v52 = vpop.f32.mrb[35].mxu0 }
 0x6e3   : > { %v1805_v53 = vpop.xlane.xlu1 %1804  ;;  %v1541_v42 = vpack.c.bf16 %v1513_v52, %v1510_v51 }
 0x6e5   : > { %2431 = vmatprep.mubr.msk.bf16.mxu0 %vm487_vm1, %v1541_v42 }
 0x6e6   : > { %2432 = vmatmul.mubr.msk.bf16.vlgmr.msra.gmra.mrb[16].mxu0 %vm487_vm1, %v1542_v11 }
 0x6e7   : > { %v1799_v23 = vpop.xlane.xlu1 %1798  ;;  %2456 = vmatpush3.bf16.msra.mxu0 %v1842_v24  ;;  %v1808_v36 = vpop.xlane.xlu0 %1807 }
 0x6e8   : > { %v2427_v43 = vpop.f32.mrb[36].mxu0  ;;  %2699 = vrcp.f32 %v1799_v23 }
 0x6e9   : > { %v1526_v46 = vpop.f32.mrb[37].mxu0 }
 0x6ea   : > { %v2428_v34 = vpop.f32.mrb[38].mxu0 }
 0x6eb   : > { %v1544_v54 = vpack.c.bf16 %v2428_v34, %v2427_v43  ;;  %v1529_v17 = vpop.f32.mrb[39].mxu0  ;;  %v1817_v55 = vpop.xlane.xlu1 %1816 }
 0x6ec   : > { %v1543_v16 = vpack.c.bf16 %v1529_v17, %v1526_v46  ;;  %v1802_v56 = vpop.xlane.xlu0 %1801 }
 0x6ed   : > { %2701 = vrcp.f32 %v1802_v56 }
 0x6ee   : > { %2435 = vmatprep.mubr.msk.bf16.mxu0 %vm487_vm1, %v1543_v16  ;;  %2703 = vrcp.f32 %v1808_v36 }
 0x6ef   : > { %2436 = vmatmul.mubr.msk.bf16.gmra.mrb[20].mxu0 %vm487_vm1, %v1544_v54  ;;  %v1811_v58 = vpop.xlane.xlu1 %1810  ;;  %2705 = vrcp.f32 %v1805_v53 }
 0x6f0   : > { %v1820_v57 = vpop.xlane.xlu0 %1819  ;;  %2707 = vrcp.f32 %v1811_v58 }
 0x6f2   : > { %v2700_v22 = vpop.eup %2699 }
 0x6f3   : > { %v1846_v59 = vpop.permute.xlu1 %1845  ;;  %v1829_v63 = vmul.f32 %v2700_v22, %v2686_v12 }
 0x6f4   : > { %v1814_v35 = vpop.xlane.xlu0 %1813 }
 0x6f5   : > { %2709 = vrcp.f32 %v1814_v35 }
 0x6f6   : > { %2711 = vrcp.f32 %v1820_v57 }
 0x6f7   : > { %v2702_v25 = vpop.eup %2701  ;;  %2713 = vrcp.f32 %v1817_v55  ;;  %v1848_v47 = vpop.permute.xlu1 %1847 }
 0x6f8   : > { %v1844_v13 = vpop.permute.xlu0 %1843  ;;  %v1830_v27 = vmul.f32 %v2702_v25, %v2690_v21  ;;  %v2704_v1 = vpop.eup %2703 }
 0x6f9   : > { %2457 = vmatprep.subr.bf16.mxu0 %v1844_v13  ;;  %v2706_v32 = vpop.eup %2705  ;;  %v1832_v30 = vmul.f32 %v2704_v1, %v3329_v19 }
 0x6fa   : > { %2458 = vmatpush3.bf16.msra.mxu0 %v1844_v13  ;;  %v1837_v0 = vpack.c.bf16 %v1830_v27, %v1829_v63  ;;  %v2708_v4 = vpop.eup %2707  ;;  %v1831_v14 = vmul.f32 %v2706_v32, %v3325_v7 }
 0x6fb   : > { %2459 = vmatprep.subr.bf16.mxu0 %v1846_v59  ;;  %v1833_v62 = vmul.f32 %v2708_v4, %v3338_v31  ;;  %v2155_v31 = vld [vmem:[%s3405_s5] ss:$0 sm:$0xff] }
 0x6fc   : > { %2463 = vmatprep.mubr.msk.bf16.mxu0 %vm577_vm2, %v1837_v0  ;;  %v1838_v33 = vpack.c.bf16 %v1832_v30, %v1831_v14 }
 0x6fe   : > { %2460 = vmatpush3.bf16.msra.mxu0 %v1846_v59 }
 0x6ff   : > { %v2710_v8 = vpop.eup %2709  ;;  %2461 = vmatprep.subr.bf16.mxu0 %v1848_v47 }
 0x700   : > { %v1834_v37 = vmul.f32 %v2710_v8, %v2698_v49  ;;  %v2712_v26 = vpop.eup %2711 }
 0x701   : > { %v2714_v6 = vpop.eup %2713  ;;  %v1836_v61 = vmul.f32 %v2712_v26, %v3341_v38 }
 0x702   : > { %2462 = vmatpush3.bf16.msra.mxu0 %v1848_v47  ;;  %v1839_v60 = vpack.c.bf16 %v1834_v37, %v1833_v62  ;;  %v1835_v24 = vmul.f32 %v2714_v6, %v3334_v40 }
 0x703   : > { %2532 = vmatprep.subr.msk.bf16.mxu0 %vm776_vm3, %v2202_v2 }
 0x704   : > { %v1840_v29 = vpack.c.bf16 %v1836_v61, %v1835_v24 }
 0x705   : > { %2464 = vmatmul.mubr.msk.bf16.vlgmr.msra.gmra.mrb[40].mxu0 %vm577_vm2, %v1838_v33 }
 0x706   : > { %2467 = vmatprep.mubr.msk.bf16.mxu0 %vm577_vm2, %v1839_v60  ;;  %2472 = vmatpush3.bf16.msra.mxu0 %v1949_v41 }
 0x70d   : > { %2468 = vmatmul.mubr.msk.bf16.gmra.mrb[44].mxu0 %vm577_vm2, %v1840_v29 }
 0x7d8   : > { %v2465_v44 = vpop.f32.mrb[40].mxu0 }
 0x7d9   : > { %v1899_v7 = vpop.f32.mrb[41].mxu0 }
 0x7da   : > { %v2466_v9 = vpop.f32.mrb[42].mxu0 }
 0x7db   : > { %v1931_v45 = vpack.c.bf16 %v2466_v9, %v2465_v44  ;;  %v1902_v50 = vpop.f32.mrb[43].mxu0 }
 0x7dc   : > { %v1930_v12 = vpack.c.bf16 %v1902_v50, %v1899_v7 }
 0x7de   : > { %2473 = vmatprep.mubr.msk.bf16.mxu0 %vm487_vm1, %v1930_v12 }
 0x7df   : > { %2474 = vmatmul.mubr.msk.bf16.vlgmr.msra.gmra.mrb[16].mxu0 %vm487_vm1, %v1931_v45 }
 0x7e0   : > { %v2469_v19 = vpop.f32.mrb[44].mxu0 }
 0x7e1   : > { %v1915_v3 = vpop.f32.mrb[45].mxu0 }
 0x7e2   : > { %v2470_v10 = vpop.f32.mrb[46].mxu0 }
 0x7e3   : > { %v1933_v21 = vpack.c.bf16 %v2470_v10, %v2469_v19  ;;  %v1918_v5 = vpop.f32.mrb[47].mxu0 }
 0x7e4   : > { %v1932_v40 = vpack.c.bf16 %v1918_v5, %v1915_v3 }
 0x7e6   : > { %2477 = vmatprep.mubr.msk.bf16.mxu0 %vm487_vm1, %v1932_v40 }
 0x7e7   : > { %2478 = vmatmul.mubr.msk.bf16.gmra.mrb[20].mxu0 %vm487_vm1, %v1933_v21 }
 0x8b2   : > { %v2475_v28 = vpop.f32.mrb[16].mxu0 }
 0x8b3   : > { %v2481_v38 = vadd.f32 %v2475_v28, %v2155_v31  ;;  %v1985_v48 = vpop.f32.mrb[17].mxu0 }
 0x8b4   : > { %v2482_v18 = vadd.f32 %v2155_v31, %v1985_v48  ;;  %v2476_v49 = vpop.f32.mrb[18].mxu0 }
 0x8b5   : > { %2026 = vst.msk [vmem:[%s312_s13 + $0x10] sm:$0xff] %vm366_vm0, %v2481_v38  ;;  %v2483_v20 = vadd.f32 %v2476_v49, %v2155_v31  ;;  %v1988_v39 = vpop.f32.mrb[19].mxu0 }
 0x8b6   : > { %2024 = vst.msk [vmem:[%s312_s13] sm:$0xff] %vm366_vm0, %v2482_v18  ;;  %v2484_v51 = vadd.f32 %v2155_v31, %v1988_v39 }
 0x8b7   : > { %2027 = vst.msk [vmem:[%s312_s13 + $0x18] sm:$0xff] %vm366_vm0, %v2483_v20 }
 0x8b8   : > { %2025 = vst.msk [vmem:[%s312_s13 + $0x8] sm:$0xff] %vm366_vm0, %v2484_v51 }
 0x8ba   : > { %v2479_v15 = vpop.f32.mrb[20].mxu0 }
 0x8bb   : > { %v2485_v11 = vadd.f32 %v2479_v15, %v2155_v31  ;;  %v2001_v52 = vpop.f32.mrb[21].mxu0 }
 0x8bc   : > { %v2486_v53 = vadd.f32 %v2155_v31, %v2001_v52  ;;  %v2480_v42 = vpop.f32.mrb[22].mxu0 }
 0x8bd   : > { %2030 = vst.msk [vmem:[%s312_s13 + $0x30] sm:$0xff] %vm366_vm0, %v2485_v11  ;;  %v2487_v23 = vadd.f32 %v2480_v42, %v2155_v31  ;;  %v2004_v36 = vpop.f32.mrb[23].mxu0 }
 0x8be   : > { %2028 = vst.msk [vmem:[%s312_s13 + $0x20] sm:$0xff] %vm366_vm0, %v2486_v53  ;;  %v2488_v43 = vadd.f32 %v2155_v31, %v2004_v36 }
 0x8bf   : > { %2031 = vst.msk [vmem:[%s312_s13 + $0x38] sm:$0xff] %vm366_vm0, %v2487_v23 }
 0x8c0   : > { %2029 = vst.msk [vmem:[%s312_s13 + $0x28] sm:$0xff] %vm366_vm0, %v2488_v43 }
 0x8c1 PF: > { %s17_s23 = sadd.s32 1, %s2769_s23   ;;  %s3415_s21 = smov %s2765_s22 }
 0x8c2   : > { %p14_p4 = scmp.ge.s32.totalorder %s17_s23, 4   ;;  %s3416_s22 = smov %s3418_s25 }
 0x8c4   :  { %16 = sbr.rel (!%p14_p4) target bundleno = 2 (0x2), region = 86 }
 0x8cb   :  { %2062 = vsyncpa [#allocation3], 1 }
 0x8cc   :  { %2064 = vsyncpa [#allocation3 + $0x1], 1 }

</bundles_post_ra>
